<compile_context>
chip_gen: v5e
topology: v5e:2x2
jax: 0.10.0
libtpu: 0.0.40
codegen_flags: <defaults>
</compile_context>

<pallas_src>
import jax
import jax.numpy as jnp
from jax import lax
from jax.experimental import pallas as pl
from jax.experimental.pallas import tpu as pltpu

# ----------------------------- config ---------------------------------------
BATCH = 2
SEQ = 8
EMB = 128          # embedding_length in the torch module
HIDDEN = 32        # hidden_size
OUT = 2            # output_size
HPAD = 128         # fc block padded to one full lane tile


# ----------------------------- Pallas kernel --------------------------------
def rcnn_kernel(xcat_ref,     # (S*B, 2E)   [x(t) | x(S-1-t)], rows ordered (t, b)
                w_in_ref,     # (2E, 8H+HP) fwd/bwd gate cols interleaved + fc_x (padded)
                b_in_ref,     # (1, 8H+HP)  matching biases (0.5-scaled i/f/o, bfc padded)
                whh_ref,      # (2H, 8H)    block-diagonal merged recurrent weights
                wfch_ref,     # (2H, HP)    fc weights for [h_fwd ; h_bwd] (col-padded)
                wout_ref,     # (HP, OUT)   head weights (row-padded)
                bout_ref,     # (1, OUT)
                logits_ref,   # (B, OUT)    output
                gall_ref,     # scratch (S*B, 8H+HP)  precomputed projections
                h_ref):       # scratch (S*B, 2H)     time-ordered [h_fwd | h_bwd]
    SB = xcat_ref.shape[0]
    B = logits_ref.shape[0]
    S = SB // B
    H2 = whh_ref.shape[0]          # 2H
    G = whh_ref.shape[1]           # 8H
    H = H2 // 2
    HP = wfch_ref.shape[1]

    # ---- (1) all non-recurrent projections in one MXU push ------------------
    gall_ref[...] = (jnp.dot(xcat_ref[...], w_in_ref[...],
                             preferred_element_type=jnp.float32)
                     + b_in_ref[...])

    # Only the merged recurrent weights stay live across the recurrence.
    whh = whh_ref[...]

    # Gate layout [i | f | o | g] (each 2H wide, fwd/bwd interleaved);
    # only the g block (last 2H columns) takes a plain tanh.
    gmask = lax.broadcasted_iota(jnp.int32, (B, G), 1) >= 3 * H2

    h = jnp.zeros((B, H2), jnp.float32)    # [h_fwd | h_bwd]
    c = jnp.zeros((B, H2), jnp.float32)    # [c_fwd | c_bwd]
    hf_t = [None] * S                      # fwd hidden states, time-ordered (vregs)
    hb_t = [None] * S                      # bwd hidden states, time-ordered (vregs)

    # ---- (2) merged fwd/bwd recurrence: one matmul + one tanh per step ------
    for s in range(S):
        gates = (jnp.dot(h, whh, preferred_element_type=jnp.float32)
                 + gall_ref[s * B:(s + 1) * B, 0:G])
        th = jnp.tanh(gates)                            # single EUP pass
        act = jnp.where(gmask, th, 0.5 * th + 0.5)      # sigmoid via folded 0.5 scale
        i = act[:, 0:H2]
        f = act[:, H2:2 * H2]
        o = act[:, 2 * H2:3 * H2]
        g = act[:, 3 * H2:4 * H2]
        c = f * c + i * g
        h = o * jnp.tanh(c)
        hf_t[s] = h[:, 0:H]               # forward hidden at time s
        hb_t[S - 1 - s] = h[:, H:H2]      # backward hidden at time S-1-s

    # Assemble the time-ordered hidden slab OFF the recurrence critical path.
    for t in range(S):
        h_ref[t * B:(t + 1) * B, 0:H] = hf_t[t]
        h_ref[t * B:(t + 1) * B, H:H2] = hb_t[t]

    # ---- (3) fc over all timesteps in ONE matmul + max-pool over time -------
    fc = (jnp.dot(h_ref[...], wfch_ref[...], preferred_element_type=jnp.float32)
          + gall_ref[:, G:G + HP])                      # (S*B, HP), lane-aligned slice

    if (S & (S - 1)) == 0:                              # S power of two: tree reduce
        while fc.shape[0] > B:
            half = fc.shape[0] // 2
            fc = jnp.maximum(fc[:half], fc[half:])
        pooled = fc
    else:                                               # generic fallback
        pooled = fc[0:B]
        for t in range(1, S):
            pooled = jnp.maximum(pooled, fc[t * B:(t + 1) * B])

    # ---- final linear head ---------------------------------------------------
    logits_ref[...] = (jnp.dot(pooled, wout_ref[...],
                               preferred_element_type=jnp.float32)
                       + bout_ref[...])


# ----------------------------- wrapper ---------------------------------------
def rcnn_forward(seq_tensor, params):
    """seq_tensor: (B, S, E) -> logits (B, OUT)."""
    B, S, E = seq_tensor.shape
    H = HIDDEN
    HP = HPAD

    # time-major, plus its time-reverse, lane-concatenated: (S*B, 2E)
    x_tbe = jnp.transpose(seq_tensor, (1, 0, 2)).astype(jnp.float32)   # (S, B, E)
    x2d = x_tbe.reshape(S * B, E)
    x2d_rev = x_tbe[::-1].reshape(S * B, E)
    xcat = jnp.concatenate([x2d, x2d_rev], axis=1)

    def gsplit(w):  # torch gate order [i, f, g, o] along last axis
        return jnp.split(w, 4, axis=-1)

    # interleaved gate layout [i_f i_b | f_f f_b | o_f o_b | g_f g_b];
    # 0.5 pre-scale on i/f/o so sigmoid(z) = 0.5*tanh(z/2) + 0.5 needs only tanh.
    def pack_fwd(i, f, g, o, z):
        return jnp.concatenate([0.5 * i, z, 0.5 * f, z, 0.5 * o, z, g, z], axis=-1)

    def pack_bwd(i, f, g, o, z):
        return jnp.concatenate([z, 0.5 * i, z, 0.5 * f, z, 0.5 * o, z, g], axis=-1)

    def pack_bias(bf, bb):
        i_f, f_f, g_f, o_f = gsplit(bf)
        i_b, f_b, g_b, o_b = gsplit(bb)
        return jnp.concatenate([0.5 * i_f, 0.5 * i_b, 0.5 * f_f, 0.5 * f_b,
                                0.5 * o_f, 0.5 * o_b, g_f, g_b], axis=-1)

    wfc = params["wfc"]                                    # (2H + E, H)

    zE = jnp.zeros((E, H), jnp.float32)
    top_gates = pack_fwd(*gsplit(params["wih_f"]), zE)     # (E, 8H)  rows = x(t)
    bot_gates = pack_bwd(*gsplit(params["wih_b"]), zE)     # (E, 8H)  rows = x(S-1-t)
    top_fc = jnp.pad(wfc[2 * H:], ((0, 0), (0, HP - H)))   # (E, HP)
    bot_fc = jnp.zeros((E, HP), jnp.float32)
    w_in = jnp.concatenate(
        [jnp.concatenate([top_gates, top_fc], axis=1),
         jnp.concatenate([bot_gates, bot_fc], axis=1)], axis=0)        # (2E, 8H+HP)

    b_in = jnp.concatenate(
        [pack_bias(params["b_f"], params["b_b"]),
         jnp.pad(params["bfc"], ((0, 0), (0, HP - H)))], axis=1)       # (1, 8H+HP)

    zH = jnp.zeros((H, H), jnp.float32)
    whh = jnp.concatenate([pack_fwd(*gsplit(params["whh_f"]), zH),
                           pack_bwd(*gsplit(params["whh_b"]), zH)], axis=0)  # (2H, 8H)

    wfch = jnp.pad(wfc[:2 * H], ((0, 0), (0, HP - H)))     # (2H, HP)
    wout = jnp.pad(params["wout"], ((0, HP - H), (0, 0)))  # (HP, OUT)
    bout = params["bout"]                                  # (1, OUT)

    args = (xcat, w_in, b_in, whh, wfch, wout, bout)

    return pl.pallas_call(
        rcnn_kernel,
        out_shape=jax.ShapeDtypeStruct((B, OUT), jnp.float32),
        in_specs=[pl.BlockSpec(memory_space=pltpu.MemorySpace.VMEM)] * len(args),
        out_specs=pl.BlockSpec(memory_space=pltpu.MemorySpace.VMEM),
        scratch_shapes=[
            pltpu.VMEM((S * B, 8 * H + HP), jnp.float32),  # precomputed projections
            pltpu.VMEM((S * B, 2 * H), jnp.float32),       # time-ordered [h_fwd|h_bwd]
        ],
    )(*args)


# ----------------------------- reference (pure JAX) --------------------------
def rcnn_reference(seq_tensor, params):
    H = HIDDEN
    xs = jnp.transpose(seq_tensor, (1, 0, 2)).astype(jnp.float32)  # (S,B,E)
    B = xs.shape[1]

    def run_dir(xs_dir, wih, whh, b):
        def step(carry, x_t):
            h, c = carry
            gates = x_t @ wih + h @ whh + b
            i = jax.nn.sigmoid(gates[:, 0 * H:1 * H])
            f = jax.nn.sigmoid(gates[:, 1 * H:2 * H])
            g = jnp.tanh(gates[:, 2 * H:3 * H])
            o = jax.nn.sigmoid(gates[:, 3 * H:4 * H])
            c = f * c + i * g
            h = o * jnp.tanh(c)
            return (h, c), h
        init = (jnp.zeros((B, H), jnp.float32), jnp.zeros((B, H), jnp.float32))
        _, hs = lax.scan(step, init, xs_dir)
        return hs

    hf = run_dir(xs, params["wih_f"], params["whh_f"], params["b_f"][0])
    hb = run_dir(xs[::-1], params["wih_b"], params["whh_b"], params["b_b"][0])[::-1]
    cat = jnp.concatenate([hf, hb, xs], axis=-1)           # (S, B, 2H+E)
    cat = jnp.transpose(cat, (1, 0, 2))                    # (B, S, 2H+E)
    fc = cat @ params["wfc"] + params["bfc"][0]            # (B, S, H)
    pooled = jnp.max(fc, axis=1)                           # (B, H)  max_pool1d
    return pooled @ params["wout"] + params["bout"][0]     # (B, OUT)


# ----------------------------- parameter init --------------------------------
def init_params(key, hidden, emb, out):
    H, E = hidden, emb
    ks = jax.random.split(key, 11)
    scale = 1.0 / jnp.sqrt(H)
    u = lambda k, shape: jax.random.uniform(k, shape, jnp.float32, -scale, scale)
    return {
        # forward-direction LSTM (torch weight_ih_l0.T etc.; bias_ih+bias_hh fused)
        "wih_f": u(ks[0], (E, 4 * H)),
        "whh_f": u(ks[1], (H, 4 * H)),
        "b_f":   u(ks[2], (1, 4 * H)),
        # reverse-direction LSTM
        "wih_b": u(ks[3], (E, 4 * H)),
        "whh_b": u(ks[4], (H, 4 * H)),
        "b_b":   u(ks[5], (1, 4 * H)),
        # fc: Linear(2H + E, H)   (input order [h_fwd, h_bwd, x])
        "wfc":  u(ks[6], (2 * H + E, H)),
        "bfc":  u(ks[7], (1, H)),
        # out: Linear(H, out)
        "wout": u(ks[8], (H, out)),
        "bout": u(ks[9], (1, out)),
    }


# ----------------------------- main -------------------------------------------
if __name__ == "__main__":
    key = jax.random.PRNGKey(0)
    k_x, k_p = jax.random.split(key)

    seq_tensor = jax.random.normal(k_x, (BATCH, SEQ, EMB), jnp.float32)
    params = init_params(k_p, HIDDEN, EMB, OUT)

    logits = rcnn_forward(seq_tensor, params)
    logits = jax.block_until_ready(logits)

    ref = rcnn_reference(seq_tensor, params)
    assert logits.shape == (BATCH, OUT)
    assert jnp.allclose(logits, ref, rtol=1e-4, atol=1e-4), (logits, ref)

    print("KERNEL_OK")
</pallas_src>

<mosaic_0001>
module attributes {stable_mosaic.version = 11 : i64} {
  func.func @rcnn_kernel(%arg0: memref<16x256xf32, #tpu.memory_space<vmem>>, %arg1: memref<256x384xf32, #tpu.memory_space<vmem>>, %arg2: memref<1x384xf32, #tpu.memory_space<vmem>>, %arg3: memref<64x256xf32, #tpu.memory_space<vmem>>, %arg4: memref<64x128xf32, #tpu.memory_space<vmem>>, %arg5: memref<128x2xf32, #tpu.memory_space<vmem>>, %arg6: memref<1x2xf32, #tpu.memory_space<vmem>>, %arg7: memref<2x2xf32, #tpu.memory_space<vmem>>, %arg8: memref<16x384xf32, #tpu.memory_space<vmem>>, %arg9: memref<16x64xf32, #tpu.memory_space<vmem>>) attributes {dimension_semantics = [], scalar_prefetch = 0 : i64, scratch_operands = 2 : i64, tpu.core_type = #tpu.core_type<tc>} {
    %c0 = arith.constant 0 : index
    %c0_0 = arith.constant 0 : index
    %0 = vector.load %arg0[%c0, %c0_0] : memref<16x256xf32, #tpu.memory_space<vmem>>, vector<16x256xf32>
    %c0_1 = arith.constant 0 : index
    %c0_2 = arith.constant 0 : index
    %1 = vector.load %arg1[%c0_1, %c0_2] : memref<256x384xf32, #tpu.memory_space<vmem>>, vector<256x384xf32>
    %cst = arith.constant dense<0.000000e+00> : vector<16x384xf32>
    %2 = tpu.matmul %0, %1, %cst {dimension_numbers = #tpu.dot_dimension_numbers<[1], [0], [0], [1], [0, 0, 1, 1], [], []>} : vector<16x256xf32>, vector<256x384xf32>, vector<16x384xf32> -> vector<16x384xf32>
    %c0_3 = arith.constant 0 : index
    %c0_4 = arith.constant 0 : index
    %3 = vector.load %arg2[%c0_3, %c0_4] : memref<1x384xf32, #tpu.memory_space<vmem>>, vector<1x384xf32>
    %4 = vector.broadcast %3 : vector<1x384xf32> to vector<16x384xf32>
    %5 = arith.addf %2, %4 : vector<16x384xf32>
    %c0_5 = arith.constant 0 : index
    %c0_6 = arith.constant 0 : index
    %6 = vector.load %arg8[%c0_5, %c0_6] : memref<16x384xf32, #tpu.memory_space<vmem>>, vector<16x384xf32>
    tpu.vector_store %arg8[%c0_5, %c0_6], %5 {strides = array<i32>} : memref<16x384xf32, #tpu.memory_space<vmem>>, vector<16x384xf32>,
    %c0_7 = arith.constant 0 : index
    %c0_8 = arith.constant 0 : index
    %7 = vector.load %arg3[%c0_7, %c0_8] : memref<64x256xf32, #tpu.memory_space<vmem>>, vector<64x256xf32>
    %8 = tpu.iota {dimensions = array<i32: 1>} : vector<2x256xi32>
    %c192_i32 = arith.constant 192 : i32
    %9 = vector.broadcast %c192_i32 : i32 to vector<2x256xi32>
    %10 = arith.cmpi sge, %8, %9 : vector<2x256xi32>
    %cst_9 = arith.constant 0.000000e+00 : f32
    %11 = vector.broadcast %cst_9 : f32 to vector<2x64xf32>
    %cst_10 = arith.constant 0.000000e+00 : f32
    %12 = vector.broadcast %cst_10 : f32 to vector<2x64xf32>
    %cst_11 = arith.constant dense<0.000000e+00> : vector<2x256xf32>
    %13 = tpu.matmul %11, %7, %cst_11 {dimension_numbers = #tpu.dot_dimension_numbers<[1], [0], [0], [1], [0, 0, 1, 1], [], []>} : vector<2x64xf32>, vector<64x256xf32>, vector<2x256xf32> -> vector<2x256xf32>
    %c0_12 = arith.constant 0 : index
    %c0_13 = arith.constant 0 : index
    %14 = vector.load %arg8[%c0_12, %c0_13] : memref<16x384xf32, #tpu.memory_space<vmem>>, vector<2x256xf32>
    %15 = arith.addf %13, %14 : vector<2x256xf32>
    %16 = math.tanh %15 : vector<2x256xf32>
    %cst_14 = arith.constant 5.000000e-01 : f32
    %17 = vector.broadcast %cst_14 : f32 to vector<2x256xf32>
    %18 = arith.mulf %17, %16 : vector<2x256xf32>
    %cst_15 = arith.constant 5.000000e-01 : f32
    %19 = vector.broadcast %cst_15 : f32 to vector<2x256xf32>
    %20 = arith.addf %18, %19 : vector<2x256xf32>
    %21 = arith.select %10, %16, %20 : vector<2x256xi1>, vector<2x256xf32>
    %22 = vector.extract_strided_slice %21 {offsets = [0, 0], sizes = [2, 64], strides = [1, 1]} : vector<2x256xf32> to vector<2x64xf32>
    %23 = vector.extract_strided_slice %21 {offsets = [0, 64], sizes = [2, 64], strides = [1, 1]} : vector<2x256xf32> to vector<2x64xf32>
    %24 = vector.extract_strided_slice %21 {offsets = [0, 128], sizes = [2, 64], strides = [1, 1]} : vector<2x256xf32> to vector<2x64xf32>
    %25 = vector.extract_strided_slice %21 {offsets = [0, 192], sizes = [2, 64], strides = [1, 1]} : vector<2x256xf32> to vector<2x64xf32>
    %26 = arith.mulf %23, %12 : vector<2x64xf32>
    %27 = arith.mulf %22, %25 : vector<2x64xf32>
    %28 = arith.addf %26, %27 : vector<2x64xf32>
    %29 = math.tanh %28 : vector<2x64xf32>
    %30 = arith.mulf %24, %29 : vector<2x64xf32>
    %31 = vector.extract_strided_slice %30 {offsets = [0, 0], sizes = [2, 32], strides = [1, 1]} : vector<2x64xf32> to vector<2x32xf32>
    %32 = vector.extract_strided_slice %30 {offsets = [0, 32], sizes = [2, 32], strides = [1, 1]} : vector<2x64xf32> to vector<2x32xf32>
    %cst_16 = arith.constant dense<0.000000e+00> : vector<2x256xf32>
    %33 = tpu.matmul %30, %7, %cst_16 {dimension_numbers = #tpu.dot_dimension_numbers<[1], [0], [0], [1], [0, 0, 1, 1], [], []>} : vector<2x64xf32>, vector<64x256xf32>, vector<2x256xf32> -> vector<2x256xf32>
    %c2 = arith.constant 2 : index
    %c0_17 = arith.constant 0 : index
    %34 = vector.load %arg8[%c2, %c0_17] : memref<16x384xf32, #tpu.memory_space<vmem>>, vector<2x256xf32>
    %35 = arith.addf %33, %34 : vector<2x256xf32>
    %36 = math.tanh %35 : vector<2x256xf32>
    %cst_18 = arith.constant 5.000000e-01 : f32
    %37 = vector.broadcast %cst_18 : f32 to vector<2x256xf32>
    %38 = arith.mulf %37, %36 : vector<2x256xf32>
    %cst_19 = arith.constant 5.000000e-01 : f32
    %39 = vector.broadcast %cst_19 : f32 to vector<2x256xf32>
    %40 = arith.addf %38, %39 : vector<2x256xf32>
    %41 = arith.select %10, %36, %40 : vector<2x256xi1>, vector<2x256xf32>
    %42 = vector.extract_strided_slice %41 {offsets = [0, 0], sizes = [2, 64], strides = [1, 1]} : vector<2x256xf32> to vector<2x64xf32>
    %43 = vector.extract_strided_slice %41 {offsets = [0, 64], sizes = [2, 64], strides = [1, 1]} : vector<2x256xf32> to vector<2x64xf32>
    %44 = vector.extract_strided_slice %41 {offsets = [0, 128], sizes = [2, 64], strides = [1, 1]} : vector<2x256xf32> to vector<2x64xf32>
    %45 = vector.extract_strided_slice %41 {offsets = [0, 192], sizes = [2, 64], strides = [1, 1]} : vector<2x256xf32> to vector<2x64xf32>
    %46 = arith.mulf %43, %28 : vector<2x64xf32>
    %47 = arith.mulf %42, %45 : vector<2x64xf32>
    %48 = arith.addf %46, %47 : vector<2x64xf32>
    %49 = math.tanh %48 : vector<2x64xf32>
    %50 = arith.mulf %44, %49 : vector<2x64xf32>
    %51 = vector.extract_strided_slice %50 {offsets = [0, 0], sizes = [2, 32], strides = [1, 1]} : vector<2x64xf32> to vector<2x32xf32>
    %52 = vector.extract_strided_slice %50 {offsets = [0, 32], sizes = [2, 32], strides = [1, 1]} : vector<2x64xf32> to vector<2x32xf32>
    %cst_20 = arith.constant dense<0.000000e+00> : vector<2x256xf32>
    %53 = tpu.matmul %50, %7, %cst_20 {dimension_numbers = #tpu.dot_dimension_numbers<[1], [0], [0], [1], [0, 0, 1, 1], [], []>} : vector<2x64xf32>, vector<64x256xf32>, vector<2x256xf32> -> vector<2x256xf32>
    %c4 = arith.constant 4 : index
    %c0_21 = arith.constant 0 : index
    %54 = vector.load %arg8[%c4, %c0_21] : memref<16x384xf32, #tpu.memory_space<vmem>>, vector<2x256xf32>
    %55 = arith.addf %53, %54 : vector<2x256xf32>
    %56 = math.tanh %55 : vector<2x256xf32>
    %cst_22 = arith.constant 5.000000e-01 : f32
    %57 = vector.broadcast %cst_22 : f32 to vector<2x256xf32>
    %58 = arith.mulf %57, %56 : vector<2x256xf32>
    %cst_23 = arith.constant 5.000000e-01 : f32
    %59 = vector.broadcast %cst_23 : f32 to vector<2x256xf32>
    %60 = arith.addf %58, %59 : vector<2x256xf32>
    %61 = arith.select %10, %56, %60 : vector<2x256xi1>, vector<2x256xf32>
    %62 = vector.extract_strided_slice %61 {offsets = [0, 0], sizes = [2, 64], strides = [1, 1]} : vector<2x256xf32> to vector<2x64xf32>
    %63 = vector.extract_strided_slice %61 {offsets = [0, 64], sizes = [2, 64], strides = [1, 1]} : vector<2x256xf32> to vector<2x64xf32>
    %64 = vector.extract_strided_slice %61 {offsets = [0, 128], sizes = [2, 64], strides = [1, 1]} : vector<2x256xf32> to vector<2x64xf32>
    %65 = vector.extract_strided_slice %61 {offsets = [0, 192], sizes = [2, 64], strides = [1, 1]} : vector<2x256xf32> to vector<2x64xf32>
    %66 = arith.mulf %63, %48 : vector<2x64xf32>
    %67 = arith.mulf %62, %65 : vector<2x64xf32>
    %68 = arith.addf %66, %67 : vector<2x64xf32>
    %69 = math.tanh %68 : vector<2x64xf32>
    %70 = arith.mulf %64, %69 : vector<2x64xf32>
    %71 = vector.extract_strided_slice %70 {offsets = [0, 0], sizes = [2, 32], strides = [1, 1]} : vector<2x64xf32> to vector<2x32xf32>
    %72 = vector.extract_strided_slice %70 {offsets = [0, 32], sizes = [2, 32], strides = [1, 1]} : vector<2x64xf32> to vector<2x32xf32>
    %cst_24 = arith.constant dense<0.000000e+00> : vector<2x256xf32>
    %73 = tpu.matmul %70, %7, %cst_24 {dimension_numbers = #tpu.dot_dimension_numbers<[1], [0], [0], [1], [0, 0, 1, 1], [], []>} : vector<2x64xf32>, vector<64x256xf32>, vector<2x256xf32> -> vector<2x256xf32>
    %c6 = arith.constant 6 : index
    %c0_25 = arith.constant 0 : index
    %74 = vector.load %arg8[%c6, %c0_25] : memref<16x384xf32, #tpu.memory_space<vmem>>, vector<2x256xf32>
    %75 = arith.addf %73, %74 : vector<2x256xf32>
    %76 = math.tanh %75 : vector<2x256xf32>
    %cst_26 = arith.constant 5.000000e-01 : f32
    %77 = vector.broadcast %cst_26 : f32 to vector<2x256xf32>
    %78 = arith.mulf %77, %76 : vector<2x256xf32>
    %cst_27 = arith.constant 5.000000e-01 : f32
    %79 = vector.broadcast %cst_27 : f32 to vector<2x256xf32>
    %80 = arith.addf %78, %79 : vector<2x256xf32>
    %81 = arith.select %10, %76, %80 : vector<2x256xi1>, vector<2x256xf32>
    %82 = vector.extract_strided_slice %81 {offsets = [0, 0], sizes = [2, 64], strides = [1, 1]} : vector<2x256xf32> to vector<2x64xf32>
    %83 = vector.extract_strided_slice %81 {offsets = [0, 64], sizes = [2, 64], strides = [1, 1]} : vector<2x256xf32> to vector<2x64xf32>
    %84 = vector.extract_strided_slice %81 {offsets = [0, 128], sizes = [2, 64], strides = [1, 1]} : vector<2x256xf32> to vector<2x64xf32>
    %85 = vector.extract_strided_slice %81 {offsets = [0, 192], sizes = [2, 64], strides = [1, 1]} : vector<2x256xf32> to vector<2x64xf32>
    %86 = arith.mulf %83, %68 : vector<2x64xf32>
    %87 = arith.mulf %82, %85 : vector<2x64xf32>
    %88 = arith.addf %86, %87 : vector<2x64xf32>
    %89 = math.tanh %88 : vector<2x64xf32>
    %90 = arith.mulf %84, %89 : vector<2x64xf32>
    %91 = vector.extract_strided_slice %90 {offsets = [0, 0], sizes = [2, 32], strides = [1, 1]} : vector<2x64xf32> to vector<2x32xf32>
    %92 = vector.extract_strided_slice %90 {offsets = [0, 32], sizes = [2, 32], strides = [1, 1]} : vector<2x64xf32> to vector<2x32xf32>
    %cst_28 = arith.constant dense<0.000000e+00> : vector<2x256xf32>
    %93 = tpu.matmul %90, %7, %cst_28 {dimension_numbers = #tpu.dot_dimension_numbers<[1], [0], [0], [1], [0, 0, 1, 1], [], []>} : vector<2x64xf32>, vector<64x256xf32>, vector<2x256xf32> -> vector<2x256xf32>
    %c8 = arith.constant 8 : index
    %c0_29 = arith.constant 0 : index
    %94 = vector.load %arg8[%c8, %c0_29] : memref<16x384xf32, #tpu.memory_space<vmem>>, vector<2x256xf32>
    %95 = arith.addf %93, %94 : vector<2x256xf32>
    %96 = math.tanh %95 : vector<2x256xf32>
    %cst_30 = arith.constant 5.000000e-01 : f32
    %97 = vector.broadcast %cst_30 : f32 to vector<2x256xf32>
    %98 = arith.mulf %97, %96 : vector<2x256xf32>
    %cst_31 = arith.constant 5.000000e-01 : f32
    %99 = vector.broadcast %cst_31 : f32 to vector<2x256xf32>
    %100 = arith.addf %98, %99 : vector<2x256xf32>
    %101 = arith.select %10, %96, %100 : vector<2x256xi1>, vector<2x256xf32>
    %102 = vector.extract_strided_slice %101 {offsets = [0, 0], sizes = [2, 64], strides = [1, 1]} : vector<2x256xf32> to vector<2x64xf32>
    %103 = vector.extract_strided_slice %101 {offsets = [0, 64], sizes = [2, 64], strides = [1, 1]} : vector<2x256xf32> to vector<2x64xf32>
    %104 = vector.extract_strided_slice %101 {offsets = [0, 128], sizes = [2, 64], strides = [1, 1]} : vector<2x256xf32> to vector<2x64xf32>
    %105 = vector.extract_strided_slice %101 {offsets = [0, 192], sizes = [2, 64], strides = [1, 1]} : vector<2x256xf32> to vector<2x64xf32>
    %106 = arith.mulf %103, %88 : vector<2x64xf32>
    %107 = arith.mulf %102, %105 : vector<2x64xf32>
    %108 = arith.addf %106, %107 : vector<2x64xf32>
    %109 = math.tanh %108 : vector<2x64xf32>
    %110 = arith.mulf %104, %109 : vector<2x64xf32>
    %111 = vector.extract_strided_slice %110 {offsets = [0, 0], sizes = [2, 32], strides = [1, 1]} : vector<2x64xf32> to vector<2x32xf32>
    %112 = vector.extract_strided_slice %110 {offsets = [0, 32], sizes = [2, 32], strides = [1, 1]} : vector<2x64xf32> to vector<2x32xf32>
    %cst_32 = arith.constant dense<0.000000e+00> : vector<2x256xf32>
    %113 = tpu.matmul %110, %7, %cst_32 {dimension_numbers = #tpu.dot_dimension_numbers<[1], [0], [0], [1], [0, 0, 1, 1], [], []>} : vector<2x64xf32>, vector<64x256xf32>, vector<2x256xf32> -> vector<2x256xf32>
    %c10 = arith.constant 10 : index
    %c0_33 = arith.constant 0 : index
    %114 = vector.load %arg8[%c10, %c0_33] : memref<16x384xf32, #tpu.memory_space<vmem>>, vector<2x256xf32>
    %115 = arith.addf %113, %114 : vector<2x256xf32>
    %116 = math.tanh %115 : vector<2x256xf32>
    %cst_34 = arith.constant 5.000000e-01 : f32
    %117 = vector.broadcast %cst_34 : f32 to vector<2x256xf32>
    %118 = arith.mulf %117, %116 : vector<2x256xf32>
    %cst_35 = arith.constant 5.000000e-01 : f32
    %119 = vector.broadcast %cst_35 : f32 to vector<2x256xf32>
    %120 = arith.addf %118, %119 : vector<2x256xf32>
    %121 = arith.select %10, %116, %120 : vector<2x256xi1>, vector<2x256xf32>
    %122 = vector.extract_strided_slice %121 {offsets = [0, 0], sizes = [2, 64], strides = [1, 1]} : vector<2x256xf32> to vector<2x64xf32>
    %123 = vector.extract_strided_slice %121 {offsets = [0, 64], sizes = [2, 64], strides = [1, 1]} : vector<2x256xf32> to vector<2x64xf32>
    %124 = vector.extract_strided_slice %121 {offsets = [0, 128], sizes = [2, 64], strides = [1, 1]} : vector<2x256xf32> to vector<2x64xf32>
    %125 = vector.extract_strided_slice %121 {offsets = [0, 192], sizes = [2, 64], strides = [1, 1]} : vector<2x256xf32> to vector<2x64xf32>
    %126 = arith.mulf %123, %108 : vector<2x64xf32>
    %127 = arith.mulf %122, %125 : vector<2x64xf32>
    %128 = arith.addf %126, %127 : vector<2x64xf32>
    %129 = math.tanh %128 : vector<2x64xf32>
    %130 = arith.mulf %124, %129 : vector<2x64xf32>
    %131 = vector.extract_strided_slice %130 {offsets = [0, 0], sizes = [2, 32], strides = [1, 1]} : vector<2x64xf32> to vector<2x32xf32>
    %132 = vector.extract_strided_slice %130 {offsets = [0, 32], sizes = [2, 32], strides = [1, 1]} : vector<2x64xf32> to vector<2x32xf32>
    %cst_36 = arith.constant dense<0.000000e+00> : vector<2x256xf32>
    %133 = tpu.matmul %130, %7, %cst_36 {dimension_numbers = #tpu.dot_dimension_numbers<[1], [0], [0], [1], [0, 0, 1, 1], [], []>} : vector<2x64xf32>, vector<64x256xf32>, vector<2x256xf32> -> vector<2x256xf32>
    %c12 = arith.constant 12 : index
    %c0_37 = arith.constant 0 : index
    %134 = vector.load %arg8[%c12, %c0_37] : memref<16x384xf32, #tpu.memory_space<vmem>>, vector<2x256xf32>
    %135 = arith.addf %133, %134 : vector<2x256xf32>
    %136 = math.tanh %135 : vector<2x256xf32>
    %cst_38 = arith.constant 5.000000e-01 : f32
    %137 = vector.broadcast %cst_38 : f32 to vector<2x256xf32>
    %138 = arith.mulf %137, %136 : vector<2x256xf32>
    %cst_39 = arith.constant 5.000000e-01 : f32
    %139 = vector.broadcast %cst_39 : f32 to vector<2x256xf32>
    %140 = arith.addf %138, %139 : vector<2x256xf32>
    %141 = arith.select %10, %136, %140 : vector<2x256xi1>, vector<2x256xf32>
    %142 = vector.extract_strided_slice %141 {offsets = [0, 0], sizes = [2, 64], strides = [1, 1]} : vector<2x256xf32> to vector<2x64xf32>
    %143 = vector.extract_strided_slice %141 {offsets = [0, 64], sizes = [2, 64], strides = [1, 1]} : vector<2x256xf32> to vector<2x64xf32>
    %144 = vector.extract_strided_slice %141 {offsets = [0, 128], sizes = [2, 64], strides = [1, 1]} : vector<2x256xf32> to vector<2x64xf32>
    %145 = vector.extract_strided_slice %141 {offsets = [0, 192], sizes = [2, 64], strides = [1, 1]} : vector<2x256xf32> to vector<2x64xf32>
    %146 = arith.mulf %143, %128 : vector<2x64xf32>
    %147 = arith.mulf %142, %145 : vector<2x64xf32>
    %148 = arith.addf %146, %147 : vector<2x64xf32>
    %149 = math.tanh %148 : vector<2x64xf32>
    %150 = arith.mulf %144, %149 : vector<2x64xf32>
    %151 = vector.extract_strided_slice %150 {offsets = [0, 0], sizes = [2, 32], strides = [1, 1]} : vector<2x64xf32> to vector<2x32xf32>
    %152 = vector.extract_strided_slice %150 {offsets = [0, 32], sizes = [2, 32], strides = [1, 1]} : vector<2x64xf32> to vector<2x32xf32>
    %cst_40 = arith.constant dense<0.000000e+00> : vector<2x256xf32>
    %153 = tpu.matmul %150, %7, %cst_40 {dimension_numbers = #tpu.dot_dimension_numbers<[1], [0], [0], [1], [0, 0, 1, 1], [], []>} : vector<2x64xf32>, vector<64x256xf32>, vector<2x256xf32> -> vector<2x256xf32>
    %c14 = arith.constant 14 : index
    %c0_41 = arith.constant 0 : index
    %154 = vector.load %arg8[%c14, %c0_41] : memref<16x384xf32, #tpu.memory_space<vmem>>, vector<2x256xf32>
    %155 = arith.addf %153, %154 : vector<2x256xf32>
    %156 = math.tanh %155 : vector<2x256xf32>
    %cst_42 = arith.constant 5.000000e-01 : f32
    %157 = vector.broadcast %cst_42 : f32 to vector<2x256xf32>
    %158 = arith.mulf %157, %156 : vector<2x256xf32>
    %cst_43 = arith.constant 5.000000e-01 : f32
    %159 = vector.broadcast %cst_43 : f32 to vector<2x256xf32>
    %160 = arith.addf %158, %159 : vector<2x256xf32>
    %161 = arith.select %10, %156, %160 : vector<2x256xi1>, vector<2x256xf32>
    %162 = vector.extract_strided_slice %161 {offsets = [0, 0], sizes = [2, 64], strides = [1, 1]} : vector<2x256xf32> to vector<2x64xf32>
    %163 = vector.extract_strided_slice %161 {offsets = [0, 64], sizes = [2, 64], strides = [1, 1]} : vector<2x256xf32> to vector<2x64xf32>
    %164 = vector.extract_strided_slice %161 {offsets = [0, 128], sizes = [2, 64], strides = [1, 1]} : vector<2x256xf32> to vector<2x64xf32>
    %165 = vector.extract_strided_slice %161 {offsets = [0, 192], sizes = [2, 64], strides = [1, 1]} : vector<2x256xf32> to vector<2x64xf32>
    %166 = arith.mulf %163, %148 : vector<2x64xf32>
    %167 = arith.mulf %162, %165 : vector<2x64xf32>
    %168 = arith.addf %166, %167 : vector<2x64xf32>
    %169 = math.tanh %168 : vector<2x64xf32>
    %170 = arith.mulf %164, %169 : vector<2x64xf32>
    %171 = vector.extract_strided_slice %170 {offsets = [0, 0], sizes = [2, 32], strides = [1, 1]} : vector<2x64xf32> to vector<2x32xf32>
    %172 = vector.extract_strided_slice %170 {offsets = [0, 32], sizes = [2, 32], strides = [1, 1]} : vector<2x64xf32> to vector<2x32xf32>
    %c0_44 = arith.constant 0 : index
    %c0_45 = arith.constant 0 : index
    %173 = vector.load %arg9[%c0_44, %c0_45] : memref<16x64xf32, #tpu.memory_space<vmem>>, vector<2x32xf32>
    tpu.vector_store %arg9[%c0_44, %c0_45], %31 {strides = array<i32>} : memref<16x64xf32, #tpu.memory_space<vmem>>, vector<2x32xf32>,
    %c0_46 = arith.constant 0 : index
    %c32 = arith.constant 32 : index
    %174 = vector.load %arg9[%c0_46, %c32] : memref<16x64xf32, #tpu.memory_space<vmem>>, vector<2x32xf32>
    tpu.vector_store %arg9[%c0_46, %c32], %172 {strides = array<i32>} : memref<16x64xf32, #tpu.memory_space<vmem>>, vector<2x32xf32>,
    %c2_47 = arith.constant 2 : index
    %c0_48 = arith.constant 0 : index
    %175 = vector.load %arg9[%c2_47, %c0_48] : memref<16x64xf32, #tpu.memory_space<vmem>>, vector<2x32xf32>
    tpu.vector_store %arg9[%c2_47, %c0_48], %51 {strides = array<i32>} : memref<16x64xf32, #tpu.memory_space<vmem>>, vector<2x32xf32>,
    %c2_49 = arith.constant 2 : index
    %c32_50 = arith.constant 32 : index
    %176 = vector.load %arg9[%c2_49, %c32_50] : memref<16x64xf32, #tpu.memory_space<vmem>>, vector<2x32xf32>
    tpu.vector_store %arg9[%c2_49, %c32_50], %152 {strides = array<i32>} : memref<16x64xf32, #tpu.memory_space<vmem>>, vector<2x32xf32>,
    %c4_51 = arith.constant 4 : index
    %c0_52 = arith.constant 0 : index
    %177 = vector.load %arg9[%c4_51, %c0_52] : memref<16x64xf32, #tpu.memory_space<vmem>>, vector<2x32xf32>
    tpu.vector_store %arg9[%c4_51, %c0_52], %71 {strides = array<i32>} : memref<16x64xf32, #tpu.memory_space<vmem>>, vector<2x32xf32>,
    %c4_53 = arith.constant 4 : index
    %c32_54 = arith.constant 32 : index
    %178 = vector.load %arg9[%c4_53, %c32_54] : memref<16x64xf32, #tpu.memory_space<vmem>>, vector<2x32xf32>
    tpu.vector_store %arg9[%c4_53, %c32_54], %132 {strides = array<i32>} : memref<16x64xf32, #tpu.memory_space<vmem>>, vector<2x32xf32>,
    %c6_55 = arith.constant 6 : index
    %c0_56 = arith.constant 0 : index
    %179 = vector.load %arg9[%c6_55, %c0_56] : memref<16x64xf32, #tpu.memory_space<vmem>>, vector<2x32xf32>
    tpu.vector_store %arg9[%c6_55, %c0_56], %91 {strides = array<i32>} : memref<16x64xf32, #tpu.memory_space<vmem>>, vector<2x32xf32>,
    %c6_57 = arith.constant 6 : index
    %c32_58 = arith.constant 32 : index
    %180 = vector.load %arg9[%c6_57, %c32_58] : memref<16x64xf32, #tpu.memory_space<vmem>>, vector<2x32xf32>
    tpu.vector_store %arg9[%c6_57, %c32_58], %112 {strides = array<i32>} : memref<16x64xf32, #tpu.memory_space<vmem>>, vector<2x32xf32>,
    %c8_59 = arith.constant 8 : index
    %c0_60 = arith.constant 0 : index
    %181 = vector.load %arg9[%c8_59, %c0_60] : memref<16x64xf32, #tpu.memory_space<vmem>>, vector<2x32xf32>
    tpu.vector_store %arg9[%c8_59, %c0_60], %111 {strides = array<i32>} : memref<16x64xf32, #tpu.memory_space<vmem>>, vector<2x32xf32>,
    %c8_61 = arith.constant 8 : index
    %c32_62 = arith.constant 32 : index
    %182 = vector.load %arg9[%c8_61, %c32_62] : memref<16x64xf32, #tpu.memory_space<vmem>>, vector<2x32xf32>
    tpu.vector_store %arg9[%c8_61, %c32_62], %92 {strides = array<i32>} : memref<16x64xf32, #tpu.memory_space<vmem>>, vector<2x32xf32>,
    %c10_63 = arith.constant 10 : index
    %c0_64 = arith.constant 0 : index
    %183 = vector.load %arg9[%c10_63, %c0_64] : memref<16x64xf32, #tpu.memory_space<vmem>>, vector<2x32xf32>
    tpu.vector_store %arg9[%c10_63, %c0_64], %131 {strides = array<i32>} : memref<16x64xf32, #tpu.memory_space<vmem>>, vector<2x32xf32>,
    %c10_65 = arith.constant 10 : index
    %c32_66 = arith.constant 32 : index
    %184 = vector.load %arg9[%c10_65, %c32_66] : memref<16x64xf32, #tpu.memory_space<vmem>>, vector<2x32xf32>
    tpu.vector_store %arg9[%c10_65, %c32_66], %72 {strides = array<i32>} : memref<16x64xf32, #tpu.memory_space<vmem>>, vector<2x32xf32>,
    %c12_67 = arith.constant 12 : index
    %c0_68 = arith.constant 0 : index
    %185 = vector.load %arg9[%c12_67, %c0_68] : memref<16x64xf32, #tpu.memory_space<vmem>>, vector<2x32xf32>
    tpu.vector_store %arg9[%c12_67, %c0_68], %151 {strides = array<i32>} : memref<16x64xf32, #tpu.memory_space<vmem>>, vector<2x32xf32>,
    %c12_69 = arith.constant 12 : index
    %c32_70 = arith.constant 32 : index
    %186 = vector.load %arg9[%c12_69, %c32_70] : memref<16x64xf32, #tpu.memory_space<vmem>>, vector<2x32xf32>
    tpu.vector_store %arg9[%c12_69, %c32_70], %52 {strides = array<i32>} : memref<16x64xf32, #tpu.memory_space<vmem>>, vector<2x32xf32>,
    %c14_71 = arith.constant 14 : index
    %c0_72 = arith.constant 0 : index
    %187 = vector.load %arg9[%c14_71, %c0_72] : memref<16x64xf32, #tpu.memory_space<vmem>>, vector<2x32xf32>
    tpu.vector_store %arg9[%c14_71, %c0_72], %171 {strides = array<i32>} : memref<16x64xf32, #tpu.memory_space<vmem>>, vector<2x32xf32>,
    %c14_73 = arith.constant 14 : index
    %c32_74 = arith.constant 32 : index
    %188 = vector.load %arg9[%c14_73, %c32_74] : memref<16x64xf32, #tpu.memory_space<vmem>>, vector<2x32xf32>
    tpu.vector_store %arg9[%c14_73, %c32_74], %32 {strides = array<i32>} : memref<16x64xf32, #tpu.memory_space<vmem>>, vector<2x32xf32>,
    %c0_75 = arith.constant 0 : index
    %c0_76 = arith.constant 0 : index
    %189 = vector.load %arg9[%c0_75, %c0_76] : memref<16x64xf32, #tpu.memory_space<vmem>>, vector<16x64xf32>
    %c0_77 = arith.constant 0 : index
    %c0_78 = arith.constant 0 : index
    %190 = vector.load %arg4[%c0_77, %c0_78] : memref<64x128xf32, #tpu.memory_space<vmem>>, vector<64x128xf32>
    %cst_79 = arith.constant dense<0.000000e+00> : vector<16x128xf32>
    %191 = tpu.matmul %189, %190, %cst_79 {dimension_numbers = #tpu.dot_dimension_numbers<[1], [0], [0], [1], [0, 0, 1, 1], [], []>} : vector<16x64xf32>, vector<64x128xf32>, vector<16x128xf32> -> vector<16x128xf32>
    %c0_80 = arith.constant 0 : index
    %c256 = arith.constant 256 : index
    %192 = vector.load %arg8[%c0_80, %c256] : memref<16x384xf32, #tpu.memory_space<vmem>>, vector<16x128xf32>
    %193 = arith.addf %191, %192 : vector<16x128xf32>
    %194 = vector.extract_strided_slice %193 {offsets = [0, 0], sizes = [8, 128], strides = [1, 1]} : vector<16x128xf32> to vector<8x128xf32>
    %195 = vector.extract_strided_slice %193 {offsets = [8, 0], sizes = [8, 128], strides = [1, 1]} : vector<16x128xf32> to vector<8x128xf32>
    %196 = arith.maximumf %194, %195 : vector<8x128xf32>
    %197 = vector.extract_strided_slice %196 {offsets = [0, 0], sizes = [4, 128], strides = [1, 1]} : vector<8x128xf32> to vector<4x128xf32>
    %198 = vector.extract_strided_slice %196 {offsets = [4, 0], sizes = [4, 128], strides = [1, 1]} : vector<8x128xf32> to vector<4x128xf32>
    %199 = arith.maximumf %197, %198 : vector<4x128xf32>
    %200 = vector.extract_strided_slice %199 {offsets = [0, 0], sizes = [2, 128], strides = [1, 1]} : vector<4x128xf32> to vector<2x128xf32>
    %201 = vector.extract_strided_slice %199 {offsets = [2, 0], sizes = [2, 128], strides = [1, 1]} : vector<4x128xf32> to vector<2x128xf32>
    %202 = arith.maximumf %200, %201 : vector<2x128xf32>
    %c0_81 = arith.constant 0 : index
    %c0_82 = arith.constant 0 : index
    %203 = vector.load %arg5[%c0_81, %c0_82] : memref<128x2xf32, #tpu.memory_space<vmem>>, vector<128x2xf32>
    %cst_83 = arith.constant dense<0.000000e+00> : vector<2x2xf32>
    %204 = tpu.matmul %202, %203, %cst_83 {dimension_numbers = #tpu.dot_dimension_numbers<[1], [0], [0], [1], [0, 0, 1, 1], [], []>} : vector<2x128xf32>, vector<128x2xf32>, vector<2x2xf32> -> vector<2x2xf32>
    %c0_84 = arith.constant 0 : index
    %c0_85 = arith.constant 0 : index
    %205 = vector.load %arg6[%c0_84, %c0_85] : memref<1x2xf32, #tpu.memory_space<vmem>>, vector<1x2xf32>
    %206 = vector.broadcast %205 : vector<1x2xf32> to vector<2x2xf32>
    %207 = arith.addf %204, %206 : vector<2x2xf32>
    %c0_86 = arith.constant 0 : index
    %c0_87 = arith.constant 0 : index
    %208 = vector.load %arg7[%c0_86, %c0_87] : memref<2x2xf32, #tpu.memory_space<vmem>>, vector<2x2xf32>
    tpu.vector_store %arg7[%c0_86, %c0_87], %207 {strides = array<i32>} : memref<2x2xf32, #tpu.memory_space<vmem>>, vector<2x2xf32>,
    return
  }
}

</mosaic_0001>

<bundles_post_ra>
// kernel: tpu_custom_call.1
= control target key start
LH: loop header
LB: loop body
LE: loop exit
PB: predicated region body
PF: predicated region fallthrough
CT: control target
= control target key end

     0   :  { %12 = vsyncpa [#allocation5], 0  ;;  %s1717_s0 = inlined_call_operand.hbm [shape: f32[16,256], index: 0, kind: input, shape index: {}]   ;;  %s1718_s1 = inlined_call_operand.hbm [shape: f32[256,384], index: 1, kind: input, shape index: {}]   ;;  %s1719_s2 = inlined_call_operand.vmem [shape: f32[1,384], index: 2, kind: input, shape index: {}]   ;;  %s1720_s3 = inlined_call_operand.vmem [shape: f32[64,256], index: 3, kind: input, shape index: {}]   ;;  %s1721_s4 = inlined_call_operand.hbm [shape: f32[64,128], index: 4, kind: input, shape index: {}]   ;;  %s1722_s5 = inlined_call_operand.vmem [shape: f32[128,2], index: 5, kind: input, shape index: {}]   ;;  %s1723_s6 = inlined_call_operand.vmem [shape: f32[1,2], index: 6, kind: input, shape index: {}]   ;;  %s1724_s7 = inlined_call_operand.hbm [shape: f32[2,2], index: 7, kind: output, shape index: {}]  }
   0x1   :  { %13 = vsyncpa [#allocation8], 0  ;;  %s32_s26 = sshll.u32 %s1718_s1, 4  ;;  %s33_s26 = int_to_ptr.hbm [resolvable:$true] %s32_s26 }
   0x2   :  { %14 = vsyncpa [#allocation6], 0  ;;  %s1251_s27 = smov [#allocation7]   ;;  %s19_s8 = sshll.u32 %s1717_s0, 4  ;;  %s20_s8 = int_to_ptr.hbm [resolvable:$true] %s19_s8 }
   0x3   :  { %s34_s28 = sshll.u32 %s1251_s27, 4  ;;  %s1252_s9 = smov 384   ;;  %s35_s28 = int_to_ptr.vmem [resolvable:$true] %s34_s28 }
   0x4   :  { %s1253_s10 = smov 24   ;;  %s1254_s11 = smov [#allocation4]  }
   0x5   :  { %40 = dma.hbm_to_vmem [thread:$0]  %s33_s26, 12288, %s35_s28, [#allocation8], %s1252_s9, %s1252_s9, %s1253_s10  }
   0x6   :  { %s21_s12 = sshll.u32 %s1254_s11, 4  ;;  %s1255_s13 = smov 256   ;;  %s22_s12 = int_to_ptr.vmem [resolvable:$true] %s21_s12 }
   0x7   :  { %s1256_s14 = smov 16   ;;  %s49_s16 = sshll.u32 %s1721_s4, 4  ;;  %s50_s16 = int_to_ptr.hbm [resolvable:$true] %s49_s16 }
   0x8   :  { %27 = dma.hbm_to_vmem [thread:$0]  %s20_s8, 512, %s22_s12, [#allocation5], %s1255_s13, %s1255_s13, %s1256_s14  }
   0x9   :  { %s1257_s17 = smov [#allocation9]   ;;  %s1258_s19 = smov 128  }
   0xa   :  { %s51_s18 = sshll.u32 %s1257_s17, 4  ;;  %s1259_s0 = smov 8   ;;  %s52_s18 = int_to_ptr.vmem [resolvable:$true] %s51_s18 }
   0xb   :  { %57 = dma.hbm_to_vmem [thread:$0]  %s50_s16, 1024, %s52_s18, [#allocation8], %s1258_s19, %s1258_s19, %s1259_s0  }
   0xc   :  { %1245 = dma.done.wait [#allocation5], 512  }
   0xd   :  { %1246 = vsyncadd [#allocation5], 4294966784 }
   0xe   :  { %1247 = dma.done.wait [#allocation8], 13312  }
   0xf   :  { %1248 = vsyncadd [#allocation8], 4294953984  ;;  %v124_v0 = vld [vmem:[#allocation7 + $0x170] sm:$0xff]  ;;  %v121_v2 = vld [vmem:[#allocation7 + $0x158] sm:$0xff]  ;;  %vm944_vm1 = vcmask 254976   ;;  %vm349_vm2 = vcmask 523264  }
  0x10   :  { %v172_v1 = vld [vmem:[#allocation7 + $0x2f0] sm:$0xff]  ;;  %228 = vmatpush.msra.mxu2 %v124_v0  ;;  %v169_v3 = vld [vmem:[#allocation7 + $0x2d8] sm:$0xff]  ;;  %v118_v4 = vld [vmem:[#allocation7 + $0x140] sm:$0xff]  ;;  %vm946_vm3 = vcmask 517376   ;;  %s1262_s9 = smov [#allocation10]   ;;  %s1061_s12 = sshll.u32 %s1724_s7, 4  ;;  %s1062_s12 = int_to_ptr.hbm [resolvable:$true] %s1061_s12 }
  0x11   :  { %251 = vmatpush.msra.mxu3 %v172_v1  ;;  %v166_v5 = vld [vmem:[#allocation7 + $0x2c0] sm:$0xff]  ;;  %v115_v6 = vld [vmem:[#allocation7 + $0x128] sm:$0xff]  ;;  %v112_v8 = vld [vmem:[#allocation7 + $0x110] sm:$0xff]  ;;  %s1059_s10 = sshll.u32 %s1262_s9, 4  ;;  %vm1052_vm4 = vcmask 9216   ;;  %s1060_s10 = int_to_ptr.vmem [resolvable:$true] %s1059_s10 }
  0x12   :  { %229 = vmatpush.msra.mxu2 %v121_v2  ;;  %v163_v7 = vld [vmem:[#allocation7 + $0x2a8] sm:$0xff]  ;;  %v160_v9 = vld [vmem:[#allocation7 + $0x290] sm:$0xff]  ;;  %v109_v10 = vld [vmem:[#allocation7 + $0xf8] sm:$0xff] }
  0x13   :  { %252 = vmatpush.msra.mxu3 %v169_v3  ;;  %v157_v11 = vld [vmem:[#allocation7 + $0x278] sm:$0xff]  ;;  %v106_v12 = vld [vmem:[#allocation7 + $0xe0] sm:$0xff]  ;;  %v103_v14 = vld [vmem:[#allocation7 + $0xc8] sm:$0xff] }
  0x14   :  { %230 = vmatpush.msra.mxu2 %v118_v4  ;;  %v154_v13 = vld [vmem:[#allocation7 + $0x260] sm:$0xff]  ;;  %v151_v15 = vld [vmem:[#allocation7 + $0x248] sm:$0xff]  ;;  %v100_v16 = vld [vmem:[#allocation7 + $0xb0] sm:$0xff] }
  0x15   :  { %253 = vmatpush.msra.mxu3 %v166_v5  ;;  %v148_v17 = vld [vmem:[#allocation7 + $0x230] sm:$0xff]  ;;  %v97_v18 = vld [vmem:[#allocation7 + $0x98] sm:$0xff]  ;;  %v123_v20 = vld [vmem:[#allocation7 + $0x168] sm:$0xff] }
  0x16   :  { %231 = vmatpush.msra.mxu2 %v115_v6  ;;  %v145_v19 = vld [vmem:[#allocation7 + $0x218] sm:$0xff]  ;;  %v171_v21 = vld [vmem:[#allocation7 + $0x2e8] sm:$0xff]  ;;  %v120_v22 = vld [vmem:[#allocation7 + $0x150] sm:$0xff]  ;;  %182 = vmatpush.msra.mxu0 %v123_v20 }
  0x17   :  { %254 = vmatpush.msra.mxu3 %v163_v7  ;;  %v168_v23 = vld [vmem:[#allocation7 + $0x2d0] sm:$0xff]  ;;  %v94_v24 = vld [vmem:[#allocation7 + $0x80] sm:$0xff]  ;;  %205 = vmatpush.msra.mxu1 %v171_v21  ;;  %v117_v26 = vld [vmem:[#allocation7 + $0x138] sm:$0xff] }
  0x18   :  { %232 = vmatpush.msra.mxu2 %v112_v8  ;;  %v142_v25 = vld [vmem:[#allocation7 + $0x200] sm:$0xff]  ;;  %v165_v27 = vld [vmem:[#allocation7 + $0x2b8] sm:$0xff]  ;;  %v91_v28 = vld [vmem:[#allocation7 + $0x68] sm:$0xff]  ;;  %183 = vmatpush.msra.mxu0 %v120_v22 }
  0x19   :  { %255 = vmatpush.msra.mxu3 %v160_v9  ;;  %v139_v29 = vld [vmem:[#allocation7 + $0x1e8] sm:$0xff]  ;;  %206 = vmatpush.msra.mxu1 %v168_v23  ;;  %v114_v30 = vld [vmem:[#allocation7 + $0x120] sm:$0xff]  ;;  %v88_v32 = vld [vmem:[#allocation7 + $0x50] sm:$0xff] }
  0x1a   :  { %233 = vmatpush.msra.mxu2 %v109_v10  ;;  %v162_v31 = vld [vmem:[#allocation7 + $0x2a0] sm:$0xff]  ;;  %v136_v33 = vld [vmem:[#allocation7 + $0x1d0] sm:$0xff]  ;;  %184 = vmatpush.msra.mxu0 %v117_v26  ;;  %v111_v34 = vld [vmem:[#allocation7 + $0x108] sm:$0xff] }
  0x1b   :  { %256 = vmatpush.msra.mxu3 %v157_v11  ;;  %207 = vmatpush.msra.mxu1 %v165_v27  ;;  %v159_v35 = vld [vmem:[#allocation7 + $0x288] sm:$0xff]  ;;  %v85_v36 = vld [vmem:[#allocation7 + $0x38] sm:$0xff]  ;;  %v108_v38 = vld [vmem:[#allocation7 + $0xf0] sm:$0xff] }
  0x1c   :  { %234 = vmatpush.msra.mxu2 %v106_v12  ;;  %v133_v37 = vld [vmem:[#allocation7 + $0x1b8] sm:$0xff]  ;;  %185 = vmatpush.msra.mxu0 %v114_v30  ;;  %v156_v39 = vld [vmem:[#allocation7 + $0x270] sm:$0xff]  ;;  %v82_v40 = vld [vmem:[#allocation7 + $0x20] sm:$0xff] }
  0x1d   :  { %257 = vmatpush.msra.mxu3 %v154_v13  ;;  %208 = vmatpush.msra.mxu1 %v162_v31  ;;  %v130_v41 = vld [vmem:[#allocation7 + $0x1a0] sm:$0xff]  ;;  %v105_v42 = vld [vmem:[#allocation7 + $0xd8] sm:$0xff]  ;;  %v79_v44 = vld [vmem:[#allocation7 + $0x8] sm:$0xff] }
  0x1e   :  { %235 = vmatpush.msra.mxu2 %v103_v14  ;;  %186 = vmatpush.msra.mxu0 %v111_v34  ;;  %v153_v43 = vld [vmem:[#allocation7 + $0x258] sm:$0xff]  ;;  %v127_v45 = vld [vmem:[#allocation7 + $0x188] sm:$0xff]  ;;  %v1312_v46 = vld [vmem:[#allocation4] sm:$0xff]  ;;  %v342_v34 = vlaneseq }
  0x1f   :  { %258 = vmatpush.msra.mxu3 %v151_v15  ;;  %209 = vmatpush.msra.mxu1 %v159_v35  ;;  %v1314_v47 = vld [vmem:[#allocation4 + $0x8] sm:$0xff]  ;;  %v1319_v48 = vld [vmem:[%s1720_s3 + $0x78] sm:$0xff]  ;;  %v102_v49 = vld [vmem:[#allocation7 + $0xc0] sm:$0xff] }
  0x20   :  { %236 = vmatpush.msra.mxu2 %v100_v16  ;;  %187 = vmatpush.msra.mxu0 %v108_v38  ;;  %v150_v50 = vld [vmem:[#allocation7 + $0x240] sm:$0xff]  ;;  %v1324_v51 = vld [vmem:[%s1720_s3 + $0x70] sm:$0xff]  ;;  %v1331_v52 = vld [vmem:[%s1720_s3 + $0x68] sm:$0xff] }
  0x21   :  { %259 = vmatpush.msra.mxu3 %v148_v17  ;;  %210 = vmatpush.msra.mxu1 %v156_v39  ;;  %v99_v53 = vld [vmem:[#allocation7 + $0xa8] sm:$0xff]  ;;  %v1337_v55 = vld [vmem:[%s1720_s3 + $0x60] sm:$0xff]  ;;  %v1342_v56 = vld [vmem:[%s1720_s3 + $0x58] sm:$0xff] }
  0x22   :  { %237 = vmatpush.msra.mxu2 %v97_v18  ;;  %188 = vmatpush.msra.mxu0 %v105_v42  ;;  %v147_v54 = vld [vmem:[#allocation7 + $0x228] sm:$0xff]  ;;  %v96_v57 = vld [vmem:[#allocation7 + $0x90] sm:$0xff]  ;;  %v93_v61 = vld [vmem:[#allocation7 + $0x78] sm:$0xff]  ;;  %v1260_v18 = vmov 0.0  }
  0x23   :  { %260 = vmatpush.msra.mxu3 %v145_v19  ;;  %211 = vmatpush.msra.mxu1 %v153_v43  ;;  %v144_v58 = vld [vmem:[#allocation7 + $0x210] sm:$0xff]  ;;  %v1354_v60 = vld [vmem:[%s1720_s3 + $0x48] sm:$0xff]  ;;  %v1360_v63 = vld [vmem:[#allocation4 + $0x18] sm:$0xff] }
  0x24   :  { %238 = vmatpush.msra.mxu2 %v94_v24  ;;  %189 = vmatpush.msra.mxu0 %v102_v49  ;;  %v1349_v59 = vld [vmem:[%s1720_s3 + $0x50] sm:$0xff]  ;;  %v1365_v0 = vld [vmem:[%s1720_s3 + $0x38] sm:$0xff]  ;;  %v90_v1 = vld [vmem:[#allocation7 + $0x60] sm:$0xff] }
  0x25   :  { %261 = vmatpush.msra.mxu3 %v142_v25  ;;  %212 = vmatpush.msra.mxu1 %v150_v50  ;;  %v1358_v62 = vld [vmem:[#allocation4 + $0x10] sm:$0xff]  ;;  %v141_v2 = vld [vmem:[#allocation7 + $0x1f8] sm:$0xff]  ;;  %v1372_v3 = vld [vmem:[%s1720_s3 + $0x40] sm:$0xff] }
  0x26   :  { %239 = vmatpush.msra.mxu2 %v91_v28  ;;  %190 = vmatpush.msra.mxu0 %v99_v53  ;;  %v1379_v4 = vld [vmem:[%s1720_s3 + $0x28] sm:$0xff]  ;;  %v138_v6 = vld [vmem:[#allocation7 + $0x1e0] sm:$0xff]  ;;  %v1385_v7 = vld [vmem:[%s1720_s3 + $0x30] sm:$0xff] }
  0x27   :  { %262 = vmatpush.msra.mxu3 %v139_v29  ;;  %213 = vmatpush.msra.mxu1 %v147_v54  ;;  %v87_v5 = vld [vmem:[#allocation7 + $0x48] sm:$0xff]  ;;  %v1390_v8 = vld [vmem:[%s1720_s3 + $0x18] sm:$0xff]  ;;  %v84_v9 = vld [vmem:[#allocation7 + $0x30] sm:$0xff] }
  0x28   :  { %240 = vmatpush.msra.mxu2 %v88_v32  ;;  %191 = vmatpush.msra.mxu0 %v96_v57  ;;  %v135_v10 = vld [vmem:[#allocation7 + $0x1c8] sm:$0xff]  ;;  %v1397_v11 = vld [vmem:[%s1720_s3 + $0x20] sm:$0xff]  ;;  %v81_v13 = vld [vmem:[#allocation7 + $0x18] sm:$0xff] }
  0x29   :  { %263 = vmatpush.msra.mxu3 %v136_v33  ;;  %214 = vmatpush.msra.mxu1 %v144_v58  ;;  %v1402_v12 = vld [vmem:[%s1720_s3 + $0x8] sm:$0xff]  ;;  %v132_v14 = vld [vmem:[#allocation7 + $0x1b0] sm:$0xff]  ;;  %v78_v15 = vld [vmem:[#allocation7] sm:$0xff] }
  0x2a   :  { %241 = vmatpush.msra.mxu2 %v85_v36  ;;  %192 = vmatpush.msra.mxu0 %v93_v61  ;;  %v1410_v16 = vld [vmem:[%s1720_s3 + $0x10] sm:$0xff]  ;;  %v129_v17 = vld [vmem:[#allocation7 + $0x198] sm:$0xff]  ;;  %v1416_v19 = vld [vmem:[%s1720_s3] sm:$0xff] }
  0x2b   :  { %264 = vmatpush.msra.mxu3 %v133_v37  ;;  %215 = vmatpush.msra.mxu1 %v141_v2  ;;  %v126_v20 = vld [vmem:[#allocation7 + $0x180] sm:$0xff] }
  0x2c   :  { %242 = vmatpush.msra.mxu2 %v82_v40  ;;  %193 = vmatpush.msra.mxu0 %v90_v1  ;;  %v1459_v21 = vld [vmem:[%s1719_s2] sm:$0x7]  ;;  %v343_v40 = vand.u32 127, %v342_v34  ;;  %s1261_s2 = smov 64  }
  0x2d   :  { %265 = vmatpush.msra.mxu3 %v130_v41  ;;  %216 = vmatpush.msra.mxu1 %v138_v6  ;;  %v177_v22 = vperm.slane %v1459_v21, 1  ;;  %v176_v30 = vperm.slane %v1459_v21, 0 }
  0x2e   :  { %243 = vmatpush.msra.mxu2 %v79_v44  ;;  %194 = vmatpush.msra.mxu0 %v87_v5  ;;  %v1465_v41 = vadd.s32 128, %v343_v40 }
  0x2f   :  { %266 = vmatpush.msra.mxu3 %v127_v45  ;;  %244 = vmatmul.f32.vlgmr.msra.gmra.mxu2 %v1312_v46 }
  0x30   :  { %267 = vmatmul.f32.vlgmr.msra.gmra.mxu3 %v1314_v47  ;;  %361 = vmatpush.msrb.mxu2 %v1324_v51  ;;  %vm346_vm0 = vcmp.ge.s32.totalorder %v1465_v41, 192 }
  0x31   :  { %381 = vmatpush.msrb.mxu3 %v1319_v48  ;;  %195 = vmatpush.msra.mxu0 %v84_v9 }
  0x32   :  { %362 = vmatpush.msrb.mxu2 %v1337_v55  ;;  %217 = vmatpush.msra.mxu1 %v135_v10 }
  0x33   :  { %382 = vmatpush.msrb.mxu3 %v1331_v52  ;;  %196 = vmatpush.msra.mxu0 %v81_v13 }
  0x34   :  { %363 = vmatpush.msrb.mxu2 %v1349_v59  ;;  %218 = vmatpush.msra.mxu1 %v132_v14 }
  0x35   :  { %383 = vmatpush.msrb.mxu3 %v1342_v56  ;;  %197 = vmatpush.msra.mxu0 %v78_v15 }
  0x36   :  { %364 = vmatpush.msrb.mxu2 %v1372_v3  ;;  %219 = vmatpush.msra.mxu1 %v129_v17 }
  0x37   :  { %384 = vmatpush.msrb.mxu3 %v1354_v60  ;;  %247 = vmatmul.f32.gmra.mxu2 %v1358_v62 }
  0x38   :  { %270 = vmatmul.f32.gmra.mxu3 %v1360_v63  ;;  %365 = vmatpush.msrb.mxu2 %v1385_v7 }
  0x39   :  { %385 = vmatpush.msrb.mxu3 %v1365_v0  ;;  %198 = vmatmul.f32.vlgmr.msra.gmra.mxu0 %v1312_v46 }
  0x3a   :  { %366 = vmatpush.msrb.mxu2 %v1397_v11  ;;  %220 = vmatpush.msra.mxu1 %v126_v20 }
  0x3b   :  { %386 = vmatpush.msrb.mxu3 %v1379_v4  ;;  %221 = vmatmul.f32.vlgmr.msra.gmra.mxu1 %v1314_v47 }
  0x3c   :  { %367 = vmatpush.msrb.mxu2 %v1410_v16 }
  0x3d   :  { %387 = vmatpush.msrb.mxu3 %v1390_v8 }
  0x3e   :  { %368 = vmatpush.msrb.mxu2 %v1416_v19 }
  0x3f   :  { %388 = vmatpush.msrb.mxu3 %v1402_v12  ;;  %369 = vmatmul.f32.vlgmr.msrb.gmra.mxu2 %v1260_v18 }
  0x40   :  { %389 = vmatmul.f32.vlgmr.msrb.gmra.mxu3 %v1260_v18  ;;  %437 = vmatpush.msra.mxu2 %v1324_v51 }
  0x41   :  { %457 = vmatpush.msra.mxu3 %v1319_v48  ;;  %201 = vmatmul.f32.gmra.mxu0 %v1358_v62 }
  0x42   :  { %438 = vmatpush.msra.mxu2 %v1337_v55 }
  0x43   :  { %458 = vmatpush.msra.mxu3 %v1331_v52  ;;  %224 = vmatmul.f32.gmra.mxu1 %v1360_v63 }
  0x44   :  { %439 = vmatpush.msra.mxu2 %v1349_v59 }
  0x45   :  { %459 = vmatpush.msra.mxu3 %v1342_v56 }
  0x46   :  { %440 = vmatpush.msra.mxu2 %v1372_v3 }
  0x47   :  { %460 = vmatpush.msra.mxu3 %v1354_v60 }
  0x48   :  { %441 = vmatpush.msra.mxu2 %v1385_v7 }
  0x49   :  { %461 = vmatpush.msra.mxu3 %v1365_v0 }
  0x4a   :  { %442 = vmatpush.msra.mxu2 %v1397_v11 }
  0x4b   :  { %462 = vmatpush.msra.mxu3 %v1379_v4 }
  0x4c   :  { %443 = vmatpush.msra.mxu2 %v1410_v16 }
  0x4d   :  { %463 = vmatpush.msra.mxu3 %v1390_v8 }
  0x4e   :  { %444 = vmatpush.msra.mxu2 %v1416_v19 }
  0x4f   :  { %464 = vmatpush.msra.mxu3 %v1402_v12 }
  0x50   :  { %533 = vmatpush.msrb.mxu2 %v1319_v48 }
  0x51   :  { %513 = vmatpush.msrb.mxu3 %v1324_v51 }
  0x52   :  { %534 = vmatpush.msrb.mxu2 %v1331_v52 }
  0x53   :  { %514 = vmatpush.msrb.mxu3 %v1337_v55 }
  0x54   :  { %535 = vmatpush.msrb.mxu2 %v1342_v56 }
  0x55   :  { %515 = vmatpush.msrb.mxu3 %v1349_v59 }
  0x56   :  { %536 = vmatpush.msrb.mxu2 %v1354_v60 }
  0x57   :  { %516 = vmatpush.msrb.mxu3 %v1372_v3 }
  0x58   :  { %537 = vmatpush.msrb.mxu2 %v1365_v0 }
  0x59   :  { %517 = vmatpush.msrb.mxu3 %v1385_v7 }
  0x5a   :  { %538 = vmatpush.msrb.mxu2 %v1379_v4 }
  0x5b   :  { %518 = vmatpush.msrb.mxu3 %v1397_v11 }
  0x5c   :  { %539 = vmatpush.msrb.mxu2 %v1390_v8 }
  0x5d   :  { %519 = vmatpush.msrb.mxu3 %v1410_v16 }
  0x5e   :  { %540 = vmatpush.msrb.mxu2 %v1402_v12 }
  0x5f   :  { %520 = vmatpush.msrb.mxu3 %v1416_v19 }
  0xb2   :  { %v245_v23 = vpop.f32.mrf.mxu2 }
  0xb3   :  { %v268_v24 = vpop.f32.mrf.mxu3  ;;  %v246_v25 = vadd.f32 %v245_v23, %v177_v22 }
  0xb5   :  { %v269_v26 = vadd.f32 %v268_v24, %v246_v25 }
  0xb6   :  { %v199_v32 = vpop.f32.mrf.mxu0 }
  0xb7   :  { %321 = vst [vmem:[#allocation2 + $0x10] sm:$0xff] %v269_v26  ;;  %v200_v33 = vadd.f32 %v199_v32, %v176_v30 }
  0xb8   :  { %v222_v35 = vpop.f32.mrf.mxu1 }
  0xb9   :  { %v223_v38 = vadd.f32 %v222_v35, %v200_v33 }
  0xba   :  { %v248_v27 = vpop.f32.mrf.mxu2 }
  0xbb   :  { %v271_v28 = vpop.f32.mrf.mxu3  ;;  %v249_v29 = vadd.f32 %v248_v27, %v177_v22  ;;  %320 = vst [vmem:[#allocation2 + $0x28] sm:$0xff] %v223_v38 }
  0xbd   :  { %v272_v31 = vadd.f32 %v271_v28, %v249_v29 }
  0xbe   :  { %v348_v36 = vld [vmem:[#allocation2 + $0x10] sm:$0x3]  ;;  %v419_v14 = vld [vmem:[#allocation2 + $0x10] sm:$0xc] }
  0xbf   :  { %324 = vst [vmem:[#allocation2 + $0x18] sm:$0xff] %v272_v31  ;;  %v423_v15 = vrot.slane %v419_v14, 2 }
  0xc2   :  { %v347_v49 = vld [vmem:[#allocation2 + $0x28] sm:$0x3]  ;;  %v370_v50 = vpop.f32.mrf.mxu2  ;;  %v418_v25 = vld [vmem:[#allocation2 + $0x28] sm:$0xc] }
  0xc3   :  { %v390_v37 = vpop.f32.mrf.mxu3  ;;  %v371_v53 = vadd.f32 %v370_v50, %v347_v49  ;;  %v422_v27 = vrot.slane %v418_v25, 2 }
  0xc4   :  { %v391_v39 = vadd.f32 %v390_v37, %v348_v36 }
  0xc6   :  { %1101 = vtanh.f32 %v391_v39 }
  0xc7   :  { %1103 = vtanh.f32 %v371_v53 }
  0xcc   :  { %v1102_v42 = vpop.eup %1101 }
  0xcd   :  { %v396_v43 = vmul.f32 0.5, %v1102_v42  ;;  %v1104_v54 = vpop.eup %1103 }
  0xce   :  { %v395_v57 = vmul.f32 0.5, %v1104_v54 }
  0xcf   :  { %v398_v44 = vadd.f32 0.5, %v396_v43 }
  0xd0   :  { %v397_v58 = vadd.f32 0.5, %v395_v57  ;;  %v494_v57 = vld [vmem:[#allocation2 + $0x28] sm:$0x30] }
  0xd1   :  { %v400_v45 = vsel %vm346_vm0, %v1102_v42, %v398_v44  ;;  %v495_v42 = vld [vmem:[#allocation2 + $0x10] sm:$0x30] }
  0xd2   :  { %403 = vrot.lane.b32.xlu0 %v400_v45, %s1261_s2  ;;  %v401_v2 = vmul.f32 0.0, %v397_v58  ;;  %v499_v43 = vrot.slane %v495_v42, 4 }
 0x144   :  { %v404_v61 = vpop.permute.xlu0 %403 }
 0x145   :  { %v406_v1 = vmul.f32 %v404_v61, %v397_v58  ;;  %v498_v61 = vrot.slane %v494_v57, 4  ;;  %v164_v57 = vld [vmem:[#allocation7 + $0x2b0] sm:$0xff] }
 0x147   :  { %408 = vrot.lane.b32.xlu0 %v406_v1, %s1261_s2 }
 0x1b9   :  { %v409_v5 = vpop.permute.xlu0 %408 }
 0x1ba   :  { %v411_v6 = vadd.f32 %v409_v5, %v401_v2 }
 0x1bc   :  { %1105 = vtanh.f32 %v411_v6 }
 0x1c2   :  { %v1106_v9 = vpop.eup %1105 }
 0x1c3   :  { %414 = vrot.lane.b32.xlu1 %v1106_v9, %s1261_s2 }
 0x235   :  { %v415_v10 = vpop.permute.xlu1 %414 }
 0x236   :  { %v1473_v13 = vmul.f32 %v415_v10, %v400_v45 }
 0x238   :  { %945 = vst.msk [vmem:[#allocation3] sm:$0x3] %vm944_vm1, %v1473_v13  ;;  %1072 = vmatmul.msk.f32.vlgmr.msra.gmra.mxu2 %vm349_vm2, %v1473_v13  ;;  %1073 = vmatmul.msk.f32.vlgmr.msra.gmra.mxu3 %vm349_vm2, %v1473_v13 }
 0x239   :  { %589 = vmatpush.msra.mxu2 %v1324_v51  ;;  %609 = vmatpush.msra.mxu3 %v1319_v48 }
 0x23b   :  { %590 = vmatpush.msra.mxu2 %v1337_v55  ;;  %610 = vmatpush.msra.mxu3 %v1331_v52 }
 0x23d   :  { %591 = vmatpush.msra.mxu2 %v1349_v59  ;;  %611 = vmatpush.msra.mxu3 %v1342_v56 }
 0x23f   :  { %592 = vmatpush.msra.mxu2 %v1372_v3  ;;  %612 = vmatpush.msra.mxu3 %v1354_v60 }
 0x241   :  { %593 = vmatpush.msra.mxu2 %v1385_v7  ;;  %613 = vmatpush.msra.mxu3 %v1365_v0 }
 0x243   :  { %594 = vmatpush.msra.mxu2 %v1397_v11  ;;  %614 = vmatpush.msra.mxu3 %v1379_v4 }
 0x245   :  { %595 = vmatpush.msra.mxu2 %v1410_v16  ;;  %615 = vmatpush.msra.mxu3 %v1390_v8 }
 0x247   :  { %596 = vmatpush.msra.mxu2 %v1416_v19  ;;  %616 = vmatpush.msra.mxu3 %v1402_v12 }
 0x2bb   :  { %v466_v17 = vpop.f32.mrf.mxu3  ;;  %v446_v26 = vpop.f32.mrf.mxu2 }
 0x2bc   :  { %v467_v18 = vadd.f32 %v466_v17, %v423_v15  ;;  %v447_v28 = vadd.f32 %v446_v26, %v422_v27 }
 0x2be   :  { %1107 = vtanh.f32 %v467_v18 }
 0x2bf   :  { %1109 = vtanh.f32 %v447_v28 }
 0x2c4   :  { %v1108_v20 = vpop.eup %1107 }
 0x2c5   :  { %v472_v22 = vmul.f32 0.5, %v1108_v20  ;;  %v1110_v29 = vpop.eup %1109 }
 0x2c6   :  { %v471_v31 = vmul.f32 0.5, %v1110_v29 }
 0x2c7   :  { %v474_v23 = vadd.f32 0.5, %v472_v22 }
 0x2c8   :  { %v473_v32 = vadd.f32 0.5, %v471_v31 }
 0x2c9   :  { %v476_v24 = vsel %vm346_vm0, %v1108_v20, %v474_v23  ;;  %v571_v23 = vld [vmem:[#allocation2 + $0x10] sm:$0xc0] }
 0x2ca   :  { %479 = vrot.lane.b32.xlu1 %v476_v24, %s1261_s2  ;;  %v477_v35 = vmul.f32 %v473_v32, %v411_v6 }
 0x33c   :  { %v480_v33 = vpop.permute.xlu1 %479 }
 0x33d   :  { %v482_v34 = vmul.f32 %v480_v33, %v473_v32  ;;  %v570_v32 = vld [vmem:[#allocation2 + $0x28] sm:$0xc0] }
 0x33f   :  { %484 = vrot.lane.b32.xlu2 %v482_v34, %s1261_s2  ;;  %v574_v34 = vrot.slane %v570_v32, 6  ;;  %v137_v32 = vld [vmem:[#allocation7 + $0x1d8] sm:$0xff] }
 0x399   :  { %v485_v36 = vpop.permute.xlu2 %484 }
 0x39a   :  { %v487_v37 = vadd.f32 %v485_v36, %v477_v35 }
 0x39c   :  { %1111 = vtanh.f32 %v487_v37 }
 0x3a2   :  { %v1112_v38 = vpop.eup %1111 }
 0x3a3   :  { %490 = vrot.lane.b32.xlu2 %v1112_v38, %s1261_s2 }
 0x3fd   :  { %v491_v39 = vpop.permute.xlu2 %490 }
 0x3fe   :  { %v1502_v40 = vmul.f32 %v491_v39, %v476_v24  ;;  %v575_v24 = vrot.slane %v571_v23, 6  ;;  %v95_v23 = vld [vmem:[#allocation7 + $0x88] sm:$0xff] }
 0x400   :  { %948 = vst.msk [vmem:[#allocation3 + $0x2] sm:$0x3] %vm944_vm1, %v1502_v40  ;;  %1074 = vmatmul.msk.f32.vlgmr.msrb.gmra.mxu3 %vm349_vm2, %v1502_v40  ;;  %1075 = vmatmul.msk.f32.vlgmr.msrb.gmra.mxu2 %vm349_vm2, %v1502_v40 }
 0x401   :  { %735 = vmatpush.msrb.mxu2 %v1324_v51  ;;  %755 = vmatpush.msrb.mxu3 %v1319_v48 }
 0x403   :  { %736 = vmatpush.msrb.mxu2 %v1337_v55  ;;  %756 = vmatpush.msrb.mxu3 %v1331_v52 }
 0x405   :  { %737 = vmatpush.msrb.mxu2 %v1349_v59  ;;  %757 = vmatpush.msrb.mxu3 %v1342_v56 }
 0x407   :  { %738 = vmatpush.msrb.mxu2 %v1372_v3  ;;  %758 = vmatpush.msrb.mxu3 %v1354_v60 }
 0x409   :  { %739 = vmatpush.msrb.mxu2 %v1385_v7  ;;  %759 = vmatpush.msrb.mxu3 %v1365_v0 }
 0x40b   :  { %740 = vmatpush.msrb.mxu2 %v1397_v11  ;;  %760 = vmatpush.msrb.mxu3 %v1379_v4 }
 0x40d   :  { %741 = vmatpush.msrb.mxu2 %v1410_v16  ;;  %761 = vmatpush.msrb.mxu3 %v1390_v8 }
 0x40f   :  { %742 = vmatpush.msrb.mxu2 %v1416_v19  ;;  %762 = vmatpush.msrb.mxu3 %v1402_v12 }
 0x483   :  { %v542_v44 = vpop.f32.mrf.mxu2  ;;  %v522_v58 = vpop.f32.mrf.mxu3 }
 0x484   :  { %v543_v45 = vadd.f32 %v542_v44, %v499_v43  ;;  %v523_v1 = vadd.f32 %v522_v58, %v498_v61  ;;  %v125_v43 = vld [vmem:[#allocation7 + $0x178] sm:$0xff]  ;;  %v122_v44 = vld [vmem:[#allocation7 + $0x160] sm:$0xff] }
 0x485   :  { %274 = vmatpush.msrb.mxu0 %v125_v43  ;;  %v113_v58 = vld [vmem:[#allocation7 + $0x118] sm:$0xff] }
 0x486   :  { %1113 = vtanh.f32 %v543_v45  ;;  %v173_v45 = vld [vmem:[#allocation7 + $0x2f8] sm:$0xff] }
 0x487   :  { %1115 = vtanh.f32 %v523_v1  ;;  %297 = vmatpush.msrb.mxu1 %v173_v45  ;;  %275 = vmatpush.msrb.mxu0 %v122_v44  ;;  %v161_v61 = vld [vmem:[#allocation7 + $0x298] sm:$0xff]  ;;  %v110_v1 = vld [vmem:[#allocation7 + $0x100] sm:$0xff] }
 0x48c   :  { %v1114_v49 = vpop.eup %1113 }
 0x48d   :  { %v548_v50 = vmul.f32 0.5, %v1114_v49  ;;  %v1116_v2 = vpop.eup %1115 }
 0x48e   :  { %v547_v5 = vmul.f32 0.5, %v1116_v2  ;;  %v158_v2 = vld [vmem:[#allocation7 + $0x280] sm:$0xff] }
 0x48f   :  { %v550_v53 = vadd.f32 0.5, %v548_v50  ;;  %v119_v50 = vld [vmem:[#allocation7 + $0x148] sm:$0xff] }
 0x490   :  { %v549_v6 = vadd.f32 0.5, %v547_v5  ;;  %276 = vmatpush.msrb.mxu0 %v119_v50  ;;  %v107_v5 = vld [vmem:[#allocation7 + $0xe8] sm:$0xff] }
 0x491   :  { %v552_v54 = vsel %vm346_vm0, %v1114_v49, %v550_v53  ;;  %v170_v49 = vld [vmem:[#allocation7 + $0x2e0] sm:$0xff]  ;;  %v167_v53 = vld [vmem:[#allocation7 + $0x2c8] sm:$0xff] }
 0x492   :  { %555 = vrot.lane.b32.xlu0 %v552_v54, %s1261_s2  ;;  %v553_v14 = vmul.f32 %v549_v6, %v487_v37  ;;  %298 = vmatpush.msrb.mxu1 %v170_v49 }
 0x494   :  { %299 = vmatpush.msrb.mxu1 %v167_v53 }
 0x496   :  { %300 = vmatpush.msrb.mxu1 %v164_v57 }
 0x498   :  { %301 = vmatpush.msrb.mxu1 %v161_v61 }
 0x49a   :  { %302 = vmatpush.msrb.mxu1 %v158_v2 }
 0x504   :  { %v556_v9 = vpop.permute.xlu0 %555 }
 0x505   :  { %v558_v10 = vmul.f32 %v556_v9, %v549_v6  ;;  %v155_v6 = vld [vmem:[#allocation7 + $0x268] sm:$0xff]  ;;  %v104_v9 = vld [vmem:[#allocation7 + $0xd0] sm:$0xff] }
 0x506   :  { %303 = vmatpush.msrb.mxu1 %v155_v6 }
 0x507   :  { %560 = vrot.lane.b32.xlu1 %v558_v10, %s1261_s2  ;;  %v152_v10 = vld [vmem:[#allocation7 + $0x250] sm:$0xff] }
 0x508   :  { %304 = vmatpush.msrb.mxu1 %v152_v10 }
 0x579   :  { %v561_v15 = vpop.permute.xlu1 %560 }
 0x57a   :  { %v1530_v17 = vadd.f32 %v561_v15, %v553_v14  ;;  %v101_v14 = vld [vmem:[#allocation7 + $0xb8] sm:$0xff] }
 0x57b   :  { %v149_v15 = vld [vmem:[#allocation7 + $0x238] sm:$0xff] }
 0x57c   :  { %1117 = vtanh.f32 %v1530_v17  ;;  %305 = vmatpush.msrb.mxu1 %v149_v15 }
 0x582   :  { %v1118_v18 = vpop.eup %1117 }
 0x583   :  { %566 = vrot.lane.b32.xlu2 %v1118_v18, %s1261_s2  ;;  %v98_v18 = vld [vmem:[#allocation7 + $0xa0] sm:$0xff] }
 0x5dd   :  { %v567_v20 = vpop.permute.xlu2 %566 }
 0x5de   :  { %v1534_v22 = vmul.f32 %v567_v20, %v552_v54  ;;  %v116_v54 = vld [vmem:[#allocation7 + $0x130] sm:$0xff]  ;;  %v146_v20 = vld [vmem:[#allocation7 + $0x220] sm:$0xff] }
 0x5df   :  { %277 = vmatpush.msrb.mxu0 %v116_v54  ;;  %306 = vmatpush.msrb.mxu1 %v146_v20 }
 0x5e0   :  { %950 = vst.msk [vmem:[#allocation3 + $0x4] sm:$0x3] %vm944_vm1, %v1534_v22  ;;  %1076 = vmatmul.msk.f32.vlgmr.msra.gmra.mxu2 %vm349_vm2, %v1534_v22  ;;  %1077 = vmatmul.msk.f32.vlgmr.msra.gmra.mxu3 %vm349_vm2, %v1534_v22 }
 0x5e1   :  { %887 = vmatpush.msra.mxu2 %v1324_v51  ;;  %907 = vmatpush.msra.mxu3 %v1319_v48 }
 0x5e2   :  { %278 = vmatpush.msrb.mxu0 %v113_v58 }
 0x5e3   :  { %888 = vmatpush.msra.mxu2 %v1337_v55  ;;  %908 = vmatpush.msra.mxu3 %v1331_v52 }
 0x5e4   :  { %279 = vmatpush.msrb.mxu0 %v110_v1 }
 0x5e5   :  { %889 = vmatpush.msra.mxu2 %v1349_v59  ;;  %909 = vmatpush.msra.mxu3 %v1342_v56 }
 0x5e6   :  { %280 = vmatpush.msrb.mxu0 %v107_v5  ;;  %v717_v5 = vld [vmem:[#allocation2 + $0x18] sm:$0xc] }
 0x5e7   :  { %890 = vmatpush.msra.mxu2 %v1372_v3  ;;  %910 = vmatpush.msra.mxu3 %v1354_v60  ;;  %v721_v6 = vrot.slane %v717_v5, 2 }
 0x5e8   :  { %281 = vmatpush.msrb.mxu0 %v104_v9 }
 0x5e9   :  { %891 = vmatpush.msra.mxu2 %v1385_v7  ;;  %911 = vmatpush.msra.mxu3 %v1365_v0 }
 0x5ea   :  { %282 = vmatpush.msrb.mxu0 %v101_v14 }
 0x5eb   :  { %892 = vmatpush.msra.mxu2 %v1397_v11  ;;  %912 = vmatpush.msra.mxu3 %v1379_v4 }
 0x5ec   :  { %283 = vmatpush.msrb.mxu0 %v98_v18 }
 0x5ed   :  { %893 = vmatpush.msra.mxu2 %v1410_v16  ;;  %913 = vmatpush.msra.mxu3 %v1390_v8 }
 0x5ee   :  { %284 = vmatpush.msrb.mxu0 %v95_v23 }
 0x5ef   :  { %894 = vmatpush.msra.mxu2 %v1416_v19  ;;  %914 = vmatpush.msra.mxu3 %v1402_v12 }
 0x663   :  { %v618_v25 = vpop.f32.mrf.mxu3  ;;  %v598_v33 = vpop.f32.mrf.mxu2 }
 0x664   :  { %v619_v26 = vadd.f32 %v618_v25, %v575_v24  ;;  %v599_v35 = vadd.f32 %v598_v33, %v574_v34  ;;  %v143_v24 = vld [vmem:[#allocation7 + $0x208] sm:$0xff]  ;;  %v92_v25 = vld [vmem:[#allocation7 + $0x70] sm:$0xff]  ;;  %v86_v34 = vld [vmem:[#allocation7 + $0x40] sm:$0xff] }
 0x665   :  { %307 = vmatpush.msrb.mxu1 %v143_v24  ;;  %285 = vmatpush.msrb.mxu0 %v92_v25 }
 0x666   :  { %1119 = vtanh.f32 %v619_v26  ;;  %v140_v26 = vld [vmem:[#allocation7 + $0x1f0] sm:$0xff] }
 0x667   :  { %1121 = vtanh.f32 %v599_v35  ;;  %308 = vmatpush.msrb.mxu1 %v140_v26  ;;  %v134_v35 = vld [vmem:[#allocation7 + $0x1c0] sm:$0xff] }
 0x669   :  { %309 = vmatpush.msrb.mxu1 %v137_v32 }
 0x66b   :  { %310 = vmatpush.msrb.mxu1 %v134_v35 }
 0x66c   :  { %v1120_v27 = vpop.eup %1119 }
 0x66d   :  { %v624_v28 = vmul.f32 0.5, %v1120_v27  ;;  %v1122_v36 = vpop.eup %1121 }
 0x66e   :  { %v623_v37 = vmul.f32 0.5, %v1122_v36  ;;  %v83_v36 = vld [vmem:[#allocation7 + $0x28] sm:$0xff] }
 0x66f   :  { %v626_v29 = vadd.f32 0.5, %v624_v28 }
 0x670   :  { %v625_v38 = vadd.f32 0.5, %v623_v37  ;;  %v131_v37 = vld [vmem:[#allocation7 + $0x1a8] sm:$0xff] }
 0x671   :  { %v1560_v31 = vsel %vm346_vm0, %v1120_v27, %v626_v29  ;;  %v89_v29 = vld [vmem:[#allocation7 + $0x58] sm:$0xff]  ;;  %311 = vmatpush.msrb.mxu1 %v131_v37 }
 0x672   :  { %631 = vrot.lane.b32.xlu0 %v1560_v31, %s1261_s2  ;;  %v629_v27 = vmul.f32 %v625_v38, %v1530_v17  ;;  %286 = vmatpush.msrb.mxu0 %v89_v29  ;;  %v80_v17 = vld [vmem:[#allocation7 + $0x10] sm:$0xff] }
 0x674   :  { %287 = vmatpush.msrb.mxu0 %v86_v34 }
 0x676   :  { %288 = vmatpush.msrb.mxu0 %v83_v36 }
 0x678   :  { %289 = vmatpush.msrb.mxu0 %v80_v17 }
 0x679   :  { %290 = vmatmul.f32.vlgmr.msrb.gmra.mxu0 %v1312_v46  ;;  %v202_v46 = vpop.f32.mrf.mxu0 }
 0x67a   :  { %659 = vmatpush.msra.mxu0 %v1324_v51 }
 0x67c   :  { %660 = vmatpush.msra.mxu0 %v1337_v55 }
 0x67e   :  { %661 = vmatpush.msra.mxu0 %v1349_v59 }
 0x680   :  { %662 = vmatpush.msra.mxu0 %v1372_v3 }
 0x681   :  { %293 = vmatmul.f32.gmra.mxu0 %v1358_v62 }
 0x682   :  { %663 = vmatpush.msra.mxu0 %v1385_v7 }
 0x684   :  { %664 = vmatpush.msra.mxu0 %v1397_v11 }
 0x686   :  { %665 = vmatpush.msra.mxu0 %v1410_v16 }
 0x688   :  { %666 = vmatpush.msra.mxu0 %v1416_v19 }
 0x68a   :  { %811 = vmatpush.msrb.mxu0 %v1324_v51 }
 0x68c   :  { %812 = vmatpush.msrb.mxu0 %v1337_v55 }
 0x68e   :  { %813 = vmatpush.msrb.mxu0 %v1349_v59 }
 0x690   :  { %814 = vmatpush.msrb.mxu0 %v1372_v3 }
 0x692   :  { %815 = vmatpush.msrb.mxu0 %v1385_v7 }
 0x694   :  { %816 = vmatpush.msrb.mxu0 %v1397_v11 }
 0x696   :  { %817 = vmatpush.msrb.mxu0 %v1410_v16 }
 0x698   :  { %818 = vmatpush.msrb.mxu0 %v1416_v19 }
 0x6e4   :  { %v632_v39 = vpop.permute.xlu0 %631 }
 0x6e5   :  { %v634_v42 = vmul.f32 %v632_v39, %v625_v38  ;;  %v128_v38 = vld [vmem:[#allocation7 + $0x190] sm:$0xff] }
 0x6e6   :  { %312 = vmatpush.msrb.mxu1 %v128_v38 }
 0x6e7   :  { %636 = vrot.lane.b32.xlu1 %v634_v42, %s1261_s2  ;;  %313 = vmatmul.f32.vlgmr.msrb.gmra.mxu1 %v1314_v47  ;;  %v225_v47 = vpop.f32.mrf.mxu1 }
 0x6e8   :  { %679 = vmatpush.msra.mxu1 %v1319_v48 }
 0x6ea   :  { %680 = vmatpush.msra.mxu1 %v1331_v52 }
 0x6ec   :  { %681 = vmatpush.msra.mxu1 %v1342_v56 }
 0x6ee   :  { %682 = vmatpush.msra.mxu1 %v1354_v60 }
 0x6ef   :  { %316 = vmatmul.f32.gmra.mxu1 %v1360_v63 }
 0x6f0   :  { %683 = vmatpush.msra.mxu1 %v1365_v0 }
 0x6f2   :  { %684 = vmatpush.msra.mxu1 %v1379_v4 }
 0x6f4   :  { %685 = vmatpush.msra.mxu1 %v1390_v8 }
 0x6f6   :  { %686 = vmatpush.msra.mxu1 %v1402_v12  ;;  %v291_v59 = vpop.f32.mrf.mxu0 }
 0x6f8   :  { %831 = vmatpush.msrb.mxu1 %v1319_v48  ;;  %v203_v48 = vadd.f32 %v202_v46, %v176_v30 }
 0x6fa   :  { %832 = vmatpush.msrb.mxu1 %v1331_v52  ;;  %v226_v51 = vadd.f32 %v225_v47, %v203_v48 }
 0x6fc   :  { %833 = vmatpush.msrb.mxu1 %v1342_v56  ;;  %323 = vst [vmem:[#allocation2] sm:$0xff] %v226_v51  ;;  %v178_v56 = vperm.slane %v1459_v21, 2 }
 0x6fe   :  { %834 = vmatpush.msrb.mxu1 %v1354_v60  ;;  %v292_v60 = vadd.f32 %v291_v59, %v178_v56 }
 0x700   :  { %835 = vmatpush.msrb.mxu1 %v1365_v0  ;;  %v294_v0 = vpop.f32.mrf.mxu0 }
 0x701   :  { %v295_v3 = vadd.f32 %v294_v0, %v178_v56 }
 0x702   :  { %836 = vmatpush.msrb.mxu1 %v1379_v4 }
 0x703   :  { %v646_v42 = vld [vmem:[#allocation2] sm:$0x3]  ;;  %v716_v23 = vld [vmem:[#allocation2] sm:$0xc]  ;;  %v792_v59 = vld [vmem:[#allocation2] sm:$0x30] }
 0x704   :  { %837 = vmatpush.msrb.mxu1 %v1390_v8  ;;  %v647_v8 = vld [vmem:[#allocation2 + $0x18] sm:$0x3]  ;;  %v720_v25 = vrot.slane %v716_v23, 2 }
 0x706   :  { %838 = vmatpush.msrb.mxu1 %v1402_v12 }
 0x759   :  { %v637_v28 = vpop.permute.xlu1 %636 }
 0x75a   :  { %v1566_v33 = vadd.f32 %v637_v28, %v629_v27 }
 0x75c   :  { %1123 = vtanh.f32 %v1566_v33 }
 0x762   :  { %v1124_v39 = vpop.eup %1123 }
 0x763   :  { %642 = vrot.lane.b32.xlu2 %v1124_v39, %s1261_s2  ;;  %v793_v39 = vld [vmem:[#allocation2 + $0x18] sm:$0x30] }
 0x764   :  { %v314_v62 = vpop.f32.mrf.mxu1  ;;  %v797_v46 = vrot.slane %v793_v39, 4  ;;  %v1022_v39 = vld [vmem:[%s1722_s5 + $0x50] sm:$0xff] }
 0x765   :  { %v1613_v63 = vadd.f32 %v314_v62, %v292_v60  ;;  %v796_v62 = vrot.slane %v792_v59, 4  ;;  %v1013_v59 = vld [vmem:[%s1722_s5 + $0x8] sm:$0xff] }
 0x76c   :  { %v317_v4 = vpop.f32.mrf.mxu1 }
 0x76d   :  { %v1615_v7 = vadd.f32 %v317_v4, %v295_v3 }
 0x7bd   :  { %v643_v52 = vpop.permute.xlu2 %642 }
 0x7be   :  { %v645_v55 = vmul.f32 %v643_v52, %v1560_v31 }
 0x7c0   :  { %952 = vst.msk [vmem:[#allocation3 + $0x6] sm:$0x3] %vm944_vm1, %v645_v55  ;;  %1078 = vmatmul.msk.f32.vlgmr.msra.gmra.mxu0 %vm349_vm2, %v645_v55  ;;  %1079 = vmatmul.msk.f32.vlgmr.msra.gmra.mxu1 %vm349_vm2, %v645_v55 }
 0x83d   :  { %v688_v11 = vpop.f32.mrf.mxu1  ;;  %v668_v31 = vpop.f32.mrf.mxu0 }
 0x83e   :  { %v689_v12 = vadd.f32 %v688_v11, %v647_v8  ;;  %v669_v43 = vadd.f32 %v668_v31, %v646_v42  ;;  %v869_v42 = vld [vmem:[#allocation2 + $0x18] sm:$0xc0] }
 0x840   :  { %1125 = vtanh.f32 %v689_v12 }
 0x841   :  { %1127 = vtanh.f32 %v669_v43  ;;  %v873_v43 = vrot.slane %v869_v42, 6 }
 0x846   :  { %v1126_v16 = vpop.eup %1125 }
 0x847   :  { %v694_v19 = vmul.f32 0.5, %v1126_v16  ;;  %v1128_v44 = vpop.eup %1127 }
 0x848   :  { %v693_v45 = vmul.f32 0.5, %v1128_v44 }
 0x849   :  { %v696_v30 = vadd.f32 0.5, %v694_v19 }
 0x84a   :  { %v695_v49 = vadd.f32 0.5, %v693_v45 }
 0x84b   :  { %v698_v21 = vsel %vm346_vm0, %v1126_v16, %v696_v30 }
 0x84c   :  { %701 = vrot.lane.b32.xlu0 %v698_v21, %s1261_s2  ;;  %v699_v54 = vmul.f32 %v695_v49, %v1566_v33 }
 0x8be   :  { %v702_v50 = vpop.permute.xlu0 %701 }
 0x8bf   :  { %v704_v53 = vmul.f32 %v702_v50, %v695_v49 }
 0x8c1   :  { %706 = vrot.lane.b32.xlu1 %v704_v53, %s1261_s2 }
 0x933   :  { %v707_v57 = vpop.permute.xlu1 %706 }
 0x934   :  { %v709_v58 = vadd.f32 %v707_v57, %v699_v54  ;;  %v868_v57 = vld [vmem:[#allocation2] sm:$0xc0] }
 0x936   :  { %1129 = vtanh.f32 %v709_v58 }
 0x93c   :  { %v1130_v61 = vpop.eup %1129 }
 0x93d   :  { %712 = vrot.lane.b32.xlu2 %v1130_v61, %s1261_s2  ;;  %v872_v61 = vrot.slane %v868_v57, 6 }
 0x997   :  { %v713_v1 = vpop.permute.xlu2 %712 }
 0x998   :  { %v715_v2 = vmul.f32 %v713_v1, %v698_v21 }
 0x99a   :  { %953 = vst.msk [vmem:[#allocation3 + $0x6] sm:$0x3] %vm946_vm3, %v715_v2  ;;  %1080 = vmatmul.msk.f32.vlgmr.msrb.gmra.mxu2 %vm349_vm2, %v715_v2  ;;  %1081 = vmatmul.msk.f32.vlgmr.msrb.gmra.mxu3 %vm349_vm2, %v715_v2 }
 0x99b   :  { %954 = vst.msk [vmem:[#allocation3 + $0x8] sm:$0x3] %vm944_vm1, %v715_v2 }
 0x99c   :  { %955 = vst.msk [vmem:[#allocation3 + $0x8] sm:$0x3] %vm946_vm3, %v645_v55 }
 0xa1d   :  { %v764_v9 = vpop.f32.mrf.mxu3  ;;  %v744_v24 = vpop.f32.mrf.mxu2 }
 0xa1e   :  { %v765_v10 = vadd.f32 %v764_v9, %v721_v6  ;;  %v745_v26 = vadd.f32 %v744_v24, %v720_v25  ;;  %v968_v24 = vld [vmem:[#allocation9 + $0x20] sm:$0xff]  ;;  %v967_v25 = vld [vmem:[#allocation9 + $0x18] sm:$0xff] }
 0xa20   :  { %1131 = vtanh.f32 %v765_v10  ;;  %v971_v10 = vld [vmem:[#allocation9 + $0x38] sm:$0xff] }
 0xa21   :  { %1133 = vtanh.f32 %v745_v26  ;;  %988 = vmatpush.msra.mxu0 %v971_v10  ;;  %v966_v26 = vld [vmem:[#allocation9 + $0x10] sm:$0xff] }
 0xa26   :  { %v1132_v14 = vpop.eup %1131 }
 0xa27   :  { %v770_v15 = vmul.f32 0.5, %v1132_v14  ;;  %v1134_v27 = vpop.eup %1133 }
 0xa28   :  { %v769_v28 = vmul.f32 0.5, %v1134_v27  ;;  %v965_v27 = vld [vmem:[#allocation9 + $0x8] sm:$0xff] }
 0xa29   :  { %v772_v18 = vadd.f32 0.5, %v770_v15  ;;  %v969_v15 = vld [vmem:[#allocation9 + $0x28] sm:$0xff] }
 0xa2a   :  { %v771_v29 = vadd.f32 0.5, %v769_v28  ;;  %v964_v28 = vld [vmem:[#allocation9] sm:$0xff] }
 0xa2b   :  { %v774_v20 = vsel %vm346_vm0, %v1132_v14, %v772_v18  ;;  %v970_v14 = vld [vmem:[#allocation9 + $0x30] sm:$0xff] }
 0xa2c   :  { %777 = vrot.lane.b32.xlu0 %v774_v20, %s1261_s2  ;;  %v775_v34 = vmul.f32 %v771_v29, %v709_v58  ;;  %989 = vmatpush.msra.mxu0 %v970_v14 }
 0xa2e   :  { %990 = vmatpush.msra.mxu0 %v969_v15 }
 0xa30   :  { %991 = vmatpush.msra.mxu0 %v968_v24 }
 0xa32   :  { %992 = vmatpush.msra.mxu0 %v967_v25 }
 0xa34   :  { %993 = vmatpush.msra.mxu0 %v966_v26 }
 0xa36   :  { %994 = vmatpush.msra.mxu0 %v965_v27 }
 0xa38   :  { %995 = vmatpush.msra.mxu0 %v964_v28 }
 0xa9e   :  { %v778_v32 = vpop.permute.xlu0 %777 }
 0xa9f   :  { %v780_v33 = vmul.f32 %v778_v32, %v771_v29  ;;  %v1027_v29 = vld [vmem:[%s1722_s5 + $0x78] sm:$0xff]  ;;  %v1026_v32 = vld [vmem:[%s1722_s5 + $0x70] sm:$0xff] }
 0xaa0   :  { %1032 = vmatpush.msra.mxu1 %v1027_v29 }
 0xaa1   :  { %782 = vrot.lane.b32.xlu1 %v780_v33, %s1261_s2  ;;  %v1025_v33 = vld [vmem:[%s1722_s5 + $0x68] sm:$0xff] }
 0xaa2   :  { %1033 = vmatpush.msra.mxu1 %v1026_v32 }
 0xaa4   :  { %1034 = vmatpush.msra.mxu1 %v1025_v33 }
 0xb13   :  { %v783_v35 = vpop.permute.xlu1 %782 }
 0xb14   :  { %v785_v36 = vadd.f32 %v783_v35, %v775_v34  ;;  %v1024_v34 = vld [vmem:[%s1722_s5 + $0x60] sm:$0xff]  ;;  %v1023_v35 = vld [vmem:[%s1722_s5 + $0x58] sm:$0xff] }
 0xb15   :  { %1035 = vmatpush.msra.mxu1 %v1024_v34 }
 0xb16   :  { %1135 = vtanh.f32 %v785_v36 }
 0xb17   :  { %1036 = vmatpush.msra.mxu1 %v1023_v35 }
 0xb19   :  { %1037 = vmatpush.msra.mxu1 %v1022_v39 }
 0xb1c   :  { %v1136_v37 = vpop.eup %1135 }
 0xb1d   :  { %788 = vrot.lane.b32.xlu2 %v1136_v37, %s1261_s2 }
 0xb77   :  { %v789_v17 = vpop.permute.xlu2 %788 }
 0xb78   :  { %v791_v38 = vmul.f32 %v789_v17, %v774_v20 }
 0xb7a   :  { %951 = vst.msk [vmem:[#allocation3 + $0x4] sm:$0x3] %vm946_vm3, %v791_v38  ;;  %1082 = vmatmul.msk.f32.vlgmr.msrb.gmra.mxu0 %vm349_vm2, %v791_v38  ;;  %1083 = vmatmul.msk.f32.vlgmr.msrb.gmra.mxu1 %vm349_vm2, %v791_v38 }
 0xb7b   :  { %956 = vst.msk [vmem:[#allocation3 + $0xa] sm:$0x3] %vm944_vm1, %v791_v38 }
 0xb7c   :  { %957 = vst.msk [vmem:[#allocation3 + $0xa] sm:$0x3] %vm946_vm3, %v1534_v22 }
 0xbf7   :  { %v840_v47 = vpop.f32.mrf.mxu1  ;;  %v820_v60 = vpop.f32.mrf.mxu0 }
 0xbf8   :  { %v841_v48 = vadd.f32 %v840_v47, %v797_v46  ;;  %v821_v0 = vadd.f32 %v820_v60, %v796_v62  ;;  %v1021_v46 = vld [vmem:[%s1722_s5 + $0x48] sm:$0xff]  ;;  %v1020_v47 = vld [vmem:[%s1722_s5 + $0x40] sm:$0xff] }
 0xbf9   :  { %1038 = vmatpush.msra.mxu1 %v1021_v46  ;;  %v1012_v60 = vld [vmem:[%s1722_s5] sm:$0xff] }
 0xbfa   :  { %1137 = vtanh.f32 %v841_v48  ;;  %v1018_v48 = vld [vmem:[%s1722_s5 + $0x30] sm:$0xff] }
 0xbfb   :  { %1139 = vtanh.f32 %v821_v0  ;;  %1039 = vmatpush.msra.mxu1 %v1020_v47 }
 0xc00   :  { %v1138_v51 = vpop.eup %1137 }
 0xc01   :  { %v846_v52 = vmul.f32 0.5, %v1138_v51  ;;  %v1140_v3 = vpop.eup %1139 }
 0xc02   :  { %v845_v22 = vmul.f32 0.5, %v1140_v3 }
 0xc03   :  { %v848_v55 = vadd.f32 0.5, %v846_v52  ;;  %v1016_v52 = vld [vmem:[%s1722_s5 + $0x20] sm:$0xff] }
 0xc04   :  { %v847_v4 = vadd.f32 0.5, %v845_v22 }
 0xc05   :  { %v850_v56 = vsel %vm346_vm0, %v1138_v51, %v848_v55  ;;  %v1017_v51 = vld [vmem:[%s1722_s5 + $0x28] sm:$0xff]  ;;  %v1015_v55 = vld [vmem:[%s1722_s5 + $0x18] sm:$0xff] }
 0xc06   :  { %853 = vrot.lane.b32.xlu0 %v850_v56, %s1261_s2  ;;  %v851_v12 = vmul.f32 %v847_v4, %v785_v36 }
 0xc78   :  { %v854_v8 = vpop.permute.xlu0 %853 }
 0xc79   :  { %v856_v11 = vmul.f32 %v854_v8, %v847_v4 }
 0xc7b   :  { %858 = vrot.lane.b32.xlu1 %v856_v11, %s1261_s2 }
 0xced   :  { %v859_v16 = vpop.permute.xlu1 %858 }
 0xcee   :  { %v861_v19 = vadd.f32 %v859_v16, %v851_v12 }
 0xcf0   :  { %1141 = vtanh.f32 %v861_v19 }
 0xcf6   :  { %v1142_v30 = vpop.eup %1141 }
 0xcf7   :  { %864 = vrot.lane.b32.xlu2 %v1142_v30, %s1261_s2 }
 0xd51   :  { %v865_v21 = vpop.permute.xlu2 %864 }
 0xd52   :  { %v867_v31 = vmul.f32 %v865_v21, %v850_v56  ;;  %v1014_v56 = vld [vmem:[%s1722_s5 + $0x10] sm:$0xff] }
 0xd54   :  { %949 = vst.msk [vmem:[#allocation3 + $0x2] sm:$0x3] %vm946_vm3, %v867_v31  ;;  %1084 = vmatmul.msk.f32.vlgmr.msra.gmra.mxu2 %vm349_vm2, %v867_v31  ;;  %1085 = vmatmul.msk.f32.vlgmr.msra.gmra.mxu3 %vm349_vm2, %v867_v31 }
 0xd55   :  { %958 = vst.msk [vmem:[#allocation3 + $0xc] sm:$0x3] %vm944_vm1, %v867_v31 }
 0xd56   :  { %959 = vst.msk [vmem:[#allocation3 + $0xc] sm:$0x3] %vm946_vm3, %v1502_v40 }
 0xdd7   :  { %v916_v44 = vpop.f32.mrf.mxu3  ;;  %v896_v58 = vpop.f32.mrf.mxu2 }
 0xdd8   :  { %v917_v45 = vadd.f32 %v916_v44, %v873_v43  ;;  %v897_v1 = vadd.f32 %v896_v58, %v872_v61 }
 0xdda   :  { %1143 = vtanh.f32 %v917_v45 }
 0xddb   :  { %1145 = vtanh.f32 %v897_v1 }
 0xde0   :  { %v1144_v49 = vpop.eup %1143 }
 0xde1   :  { %v922_v50 = vmul.f32 0.5, %v1144_v49  ;;  %v1146_v2 = vpop.eup %1145 }
 0xde2   :  { %v921_v40 = vmul.f32 0.5, %v1146_v2 }
 0xde3   :  { %v924_v53 = vadd.f32 0.5, %v922_v50 }
 0xde4   :  { %v923_v5 = vadd.f32 0.5, %v921_v40 }
 0xde5   :  { %v926_v54 = vsel %vm346_vm0, %v1144_v49, %v924_v53 }
 0xde6   :  { %929 = vrot.lane.b32.xlu0 %v926_v54, %s1261_s2  ;;  %v927_v41 = vmul.f32 %v923_v5, %v861_v19  ;;  %v1100_v19 = vld [vmem:[%s1723_s6] ss:$0 sm:$0xff] }
 0xe58   :  { %v930_v6 = vpop.permute.xlu0 %929 }
 0xe59   :  { %v932_v9 = vmul.f32 %v930_v6, %v923_v5 }
 0xe5b   :  { %934 = vrot.lane.b32.xlu1 %v932_v9, %s1261_s2 }
 0xecd   :  { %v935_v18 = vpop.permute.xlu1 %934 }
 0xece   :  { %v937_v20 = vadd.f32 %v935_v18, %v927_v41 }
 0xed0   :  { %1147 = vtanh.f32 %v937_v20 }
 0xed6   :  { %v1148_v23 = vpop.eup %1147 }
 0xed7   :  { %940 = vrot.lane.b32.xlu2 %v1148_v23, %s1261_s2 }
 0xf31   :  { %v941_v36 = vpop.permute.xlu2 %940 }
 0xf32   :  { %v943_v37 = vmul.f32 %v941_v36, %v926_v54 }
 0xf34   :  { %947 = vst.msk [vmem:[#allocation3] sm:$0x3] %vm946_vm3, %v943_v37 }
 0xf35   :  { %960 = vst.msk [vmem:[#allocation3 + $0xe] sm:$0x3] %vm944_vm1, %v943_v37 }
 0xf36   :  { %961 = vst.msk [vmem:[#allocation3 + $0xe] sm:$0x3] %vm946_vm3, %v1473_v13  ;;  %v1019_v13 = vld [vmem:[%s1722_s5 + $0x38] sm:$0xff] }
 0xf37   :  { %1040 = vmatpush.msra.mxu1 %v1019_v13 }
 0xf39   :  { %1041 = vmatpush.msra.mxu1 %v1018_v48 }
 0xf3b   :  { %v962_v17 = vld [vmem:[#allocation3] sm:$0xff]  ;;  %1042 = vmatpush.msra.mxu1 %v1017_v51 }
 0xf3c   :  { %1086 = vmatmul.msk.f32.vlgmr.msra.gmra.mxu0 %vm349_vm2, %v962_v17 }
 0xf3d   :  { %v963_v38 = vld [vmem:[#allocation3 + $0x8] sm:$0xff]  ;;  %1043 = vmatpush.msra.mxu1 %v1016_v52 }
 0xf3f   :  { %1044 = vmatpush.msra.mxu1 %v1015_v55 }
 0xf41   :  { %1045 = vmatpush.msra.mxu1 %v1014_v56 }
 0xf43   :  { %1046 = vmatpush.msra.mxu1 %v1013_v59 }
 0xf44   :  { %1087 = vmatmul.msk.f32.gmra.mxu0 %vm349_vm2, %v963_v38 }
 0xf45   :  { %1047 = vmatpush.msra.mxu1 %v1012_v60 }
 0xfb9   :  { %v997_v62 = vpop.f32.mrf.mxu0 }
 0xfba   :  { %v998_v3 = vadd.f32 %v997_v62, %v1613_v63 }
 0xfc1   :  { %v1000_v0 = vpop.f32.mrf.mxu0 }
 0xfc2   :  { %v1001_v22 = vadd.f32 %v1000_v0, %v1615_v7 }
 0xfc4   :  { %v1003_v4 = vmax.f32 %v998_v3, %v1001_v22 }
 0xfc6   :  { %v1005_v8 = vrot.slane %v1003_v4, 4 }
 0xfc8   :  { %v1007_v11 = vmax.f32 %v1003_v4, %v1005_v8 }
 0xfca   :  { %v1009_v12 = vrot.slane %v1007_v11, 2 }
 0xfcc   :  { %v1011_v16 = vmax.f32 %v1007_v11, %v1009_v12 }
 0xfce   :  { %1048 = vmatmul.f32.vlgmr.msra.gmra.mxu1 %v1011_v16 }
0x104b   :  { %v1049_v30 = vpop.f32.mrf.mxu1 }
0x104c   :  { %v1050_v63 = vadd.f32 %v1100_v19, %v1049_v30 }
0x104e   :  { %1053 = vst.msk [vmem:[#allocation10] sm:$0x3] %vm1052_vm4, %v1050_v63 }
0x104f   :  { %1064 = dma.vmem_to_hbm [thread:$0]  %s1060_s10, 32, %s1062_s12, [#allocation6]  }
0x1050   :  { %1249 = dma.done.wait [#allocation6], 32  }
0x1051   :  { %1250 = vsyncadd [#allocation6], 4294967264 }
0x1052   :  { %1069 = vsyncpa [#allocation5], 1 }
0x1053   :  { %1070 = vsyncpa [#allocation8], 1 }
0x1054   :  { %1071 = vsyncpa [#allocation6], 1 }

</bundles_post_ra>
